<compile_context>
chip_gen: v6e
topology: v6e:2x2x1
jax: 0.10.0
libtpu: 0.0.40
codegen_flags: <defaults>
</compile_context>

<pallas_src>
import functools
import math

import jax
import jax.numpy as jnp
import numpy as np
from jax.experimental import pallas as pl
from jax.experimental.pallas import tpu as pltpu


# ----------------------------------------------------------------------------
# fused decoder kernel: `bt` batch elements per grid step, all layers inside
# ----------------------------------------------------------------------------
def _decoder_kernel(x_ref, st_ref, sup_ref, *refs, L, K, H):
    h_ref = refs[-1]
    wrefs = refs[:-1]

    f32, bf16 = jnp.float32, jnp.bfloat16
    BT, N, _ = x_ref.shape
    BS = sup_ref.shape[0]            # bt (dynamic graph) or 1 (shared graph)

    def mm(a, b):
        # bf16 x bf16 -> f32 single-pass MXU matmul (f32 accumulation).
        return jnp.dot(a, b, preferred_element_type=f32)

    def gdot(g_bf, x_bf):
        # graph matmul: per-batch clean 2-D (N,N)@(N,C) MXU calls, stacked back.
        return jnp.stack(
            [mm(g_bf[b if BS > 1 else 0], x_bf[b]) for b in range(x_bf.shape[0])],
            axis=0)

    # Chebyshev stack T_1..T_{K-1}, held once in bf16 (T_0 = I needs no matmul).
    gks = []
    if K >= 2:
        sup_bf = sup_ref[...]                       # (BS, N, N) bf16
        gks.append(sup_bf)
        if K >= 3:
            two_sup_bf = sup_bf + sup_bf            # exact doubling in bf16
            prev2 = jnp.eye(N, dtype=f32)           # T_0 (broadcasts over BS)
            prev1 = sup_bf.astype(f32)              # T_1
            for _ in range(2, K):
                nxt = gdot(two_sup_bf, prev1.astype(bf16)) - prev2
                gks.append(nxt.astype(bf16))
                prev2, prev1 = prev1, nxt

    cur_bf = x_ref[...].astype(bf16)                # (BT, N, d), cast once
    for l in range(L):
        wg_ref, bg_ref, wu_ref, bu_ref = wrefs[4 * l: 4 * l + 4]
        state = st_ref[:, l]                        # (BT, N, H) f32
        d = cur_bf.shape[-1]

        # graph conv of [x, state] together (input half shared with candidate).
        cs_bf = jnp.concatenate([cur_bf, state.astype(bf16)], axis=-1)
        gb = [cs_bf] + [gdot(g, cs_bf).astype(bf16) for g in gks]

        # gate: ONE wide matmul, contraction K*(d+H), M = bt*N rows.
        gcat = jnp.concatenate(gb, axis=-1).reshape(BT * N, K * (d + H))
        zr = jax.nn.sigmoid(mm(gcat, wg_ref[...]) + bg_ref[...])
        zr = zr.reshape(BT, N, 2 * H)
        z, r = zr[..., :H], zr[..., H:]

        # candidate: reuse T_k @ x from gb, graph-conv only z*state anew.
        zs_bf = (z * state).astype(bf16)
        gz = [zs_bf] + [gdot(g, zs_bf).astype(bf16) for g in gks]
        cand = []
        for k in range(K):
            cand.append(cur_bf if k == 0 else gb[k][..., :d])
            cand.append(gz[k])
        ccat = jnp.concatenate(cand, axis=-1).reshape(BT * N, K * (d + H))
        hc = jnp.tanh(mm(ccat, wu_ref[...]) + bu_ref[...]).reshape(BT, N, H)

        h = r * state + (1.0 - r) * hc              # (BT, N, H) f32 GRU math
        h_ref[:, l] = h.reshape(BT, N * H)          # lane-dense store (N*H lanes)
        cur_bf = h.astype(bf16)
        # TODO(synk): for very large N/H/L, stage gb/gz through a reused VMEM
        # scratch to bound live ranges across the unrolled layer loop.


# ----------------------------------------------------------------------------
# Pallas wrapper (mirrors ADCRNN_Decoder.forward)
# ----------------------------------------------------------------------------
def adcrnn_decoder_pallas(xt, init_state, support, layer_params, *, cheb_k,
                          batch_tile=None):
    """Returns (current_inputs, output_hidden) like ADCRNN_Decoder.forward."""
    # TODO(synk): only a single support per AGCN is handled (multiple supports
    # would not match the PyTorch weight shape cheb_k*(dim_in+dim_out) anyway).
    B, N, d0 = xt.shape
    L = len(layer_params)
    H = layer_params[0]['wu'].shape[-1]
    K = cheb_k

    xt = xt.astype(jnp.float32)
    st = jnp.stack(init_state, axis=1).astype(jnp.float32)        # (B, L, N, H)

    if support.ndim == 2:
        sup, sup_batched = support[None], False
    elif support.shape[0] == B:
        sup, sup_batched = support, True
    elif support.shape[0] == 1:
        sup, sup_batched = support, False
    else:
        raise ValueError("support batch must be 1 or B")
    sup = sup.astype(jnp.bfloat16)            # MXU-only consumer -> halve DMA

    # Batch tile: fold bt*N rows into the M dim of every weight matmul.
    if batch_tile is None:
        bt = min(B, max(1, int(pl.cdiv(128, N))))
    else:
        bt = max(1, min(B, int(batch_tile)))
    while B % bt:
        bt -= 1

    sup_spec = (pl.BlockSpec((bt, N, N), lambda b: (b, 0, 0)) if sup_batched
                else pl.BlockSpec((1, N, N), lambda b: (0, 0, 0)))

    # Weights/biases with constant index maps -> DMA'd once, resident across the
    # whole batch grid; MXU weights fed in bf16, biases stay f32.
    flat_w, w_specs = [], []
    for p in layer_params:
        for e in (p['wg'].astype(jnp.bfloat16),
                  p['bg'].reshape(1, -1).astype(jnp.float32),
                  p['wu'].astype(jnp.bfloat16),
                  p['bu'].reshape(1, -1).astype(jnp.float32)):
            flat_w.append(e)
            w_specs.append(pl.BlockSpec(e.shape, lambda b: (0, 0)))

    # Rough VMEM budget (double-buffered I/O + resident weights + activations),
    # clamped to [32 MiB, 64 MiB] so it is safe on v5e/v6e/v7x alike.
    bytes_w = sum(int(np.prod(a.shape)) * a.dtype.itemsize for a in flat_w)
    sup_rows = bt if sup_batched else 1
    bytes_io = bt * N * d0 * 4 + 2 * bt * L * N * H * 4 + sup_rows * N * N * 2
    bytes_cheb = max(K - 1, 1) * sup_rows * N * N * 2
    bytes_act = 8 * bt * N * K * (max(d0, H) + H) * 4
    est = 2 * bytes_io + 2 * bytes_w + bytes_cheb + bytes_act
    vmem_limit = int(min(max(est + (8 << 20), 32 << 20), 64 << 20))

    out = pl.pallas_call(
        functools.partial(_decoder_kernel, L=L, K=K, H=H),
        out_shape=jax.ShapeDtypeStruct((B, L, N * H), jnp.float32),
        grid=(B // bt,),
        in_specs=[
            pl.BlockSpec((bt, N, d0), lambda b: (b, 0, 0)),
            pl.BlockSpec((bt, L, N, H), lambda b: (b, 0, 0, 0)),
            sup_spec,
            *w_specs,
        ],
        out_specs=pl.BlockSpec((bt, L, N * H), lambda b: (b, 0, 0)),
        compiler_params=pltpu.CompilerParams(
            dimension_semantics=("parallel",),
            vmem_limit_bytes=vmem_limit),
    )(xt, st, sup, *flat_w)

    out = out.reshape(B, L, N, H)
    output_hidden = [out[:, l] for l in range(L)]
    return output_hidden[-1], output_hidden


# ----------------------------------------------------------------------------
# pure-JAX reference (faithful to the PyTorch formulation, same bf16/f32 path)
# ----------------------------------------------------------------------------
def _bmm(a, b):
    return jnp.matmul(a.astype(jnp.bfloat16), b.astype(jnp.bfloat16),
                      preferred_element_type=jnp.float32)


def _agcn_ref(x, supports, w, b, cheb_k):
    x_g = []
    for support in supports:
        if support.ndim == 2:
            n = support.shape[0]
            ks = [jnp.eye(n, dtype=jnp.float32), support]
        else:
            bsz, n, _ = support.shape
            ks = [jnp.broadcast_to(jnp.eye(n, dtype=jnp.float32), (bsz, n, n)),
                  support]
        for _ in range(2, cheb_k):
            ks.append(_bmm(2.0 * support, ks[-1]) - ks[-2])
        ks = ks[:max(cheb_k, 1)]
        for g in ks:
            x_g.append(_bmm(g, x))
    x_g = jnp.concatenate(x_g, axis=-1)
    return _bmm(x_g, w) + b


def _agcrn_cell_ref(x, state, supports, p, cheb_k, H):
    ins = jnp.concatenate([x, state], axis=-1)
    zr = jax.nn.sigmoid(_agcn_ref(ins, supports, p['wg'], p['bg'], cheb_k))
    z, r = zr[..., :H], zr[..., H:]
    cand = jnp.concatenate([x, z * state], axis=-1)
    hc = jnp.tanh(_agcn_ref(cand, supports, p['wu'], p['bu'], cheb_k))
    return r * state + (1.0 - r) * hc


def adcrnn_decoder_ref(xt, init_state, supports, layer_params, *, cheb_k):
    H = layer_params[0]['wu'].shape[-1]
    cur, hidden = xt, []
    for l, p in enumerate(layer_params):
        s = _agcrn_cell_ref(cur, init_state[l], supports, p, cheb_k, H)
        hidden.append(s)
        cur = s
    return cur, hidden


# ----------------------------------------------------------------------------
# deterministic parameter init (shapes from AGCN / AGCRNCell __init__)
# ----------------------------------------------------------------------------
def init_decoder_params(key, dim_in, dim_out, cheb_k, rnn_layers):
    def xavier(k, shape):
        std = math.sqrt(2.0 / (shape[0] + shape[1]))
        return (std * jax.random.normal(k, shape)).astype(jnp.float32)

    params = []
    keys = jax.random.split(key, 4 * rnn_layers)
    for l in range(rnn_layers):
        d = dim_in if l == 0 else dim_out
        kg, ku, kbg, kbu = keys[4 * l: 4 * l + 4]
        params.append(dict(
            wg=xavier(kg, (cheb_k * (d + dim_out), 2 * dim_out)),
            bg=(0.01 * jax.random.normal(kbg, (2 * dim_out,))).astype(jnp.float32),
            wu=xavier(ku, (cheb_k * (d + dim_out), dim_out)),
            bu=(0.01 * jax.random.normal(kbu, (dim_out,))).astype(jnp.float32),
        ))
    return params


if __name__ == "__main__":
    B, N = 2, 16
    dim_in, dim_out = 4, 32            # decoder input channels / hidden size
    cheb_k, rnn_layers = 3, 2

    root = jax.random.PRNGKey(0)
    kp, kx, ks, ka = jax.random.split(root, 4)
    params = init_decoder_params(kp, dim_in, dim_out, cheb_k, rnn_layers)

    xt = jax.random.normal(kx, (B, N, dim_in), dtype=jnp.float32)
    state_keys = jax.random.split(ks, rnn_layers)
    init_state = [0.5 * jax.random.normal(state_keys[l], (B, N, dim_out),
                                          dtype=jnp.float32)
                  for l in range(rnn_layers)]
    # dynamic batched support, as produced by DGCRN's hyper-network
    emb = jax.random.normal(ka, (B, N, 8), dtype=jnp.float32)
    support = jax.nn.softmax(
        jax.nn.relu(jnp.einsum('bne,bme->bnm', emb, emb)), axis=-1)

    fwd = jax.jit(functools.partial(adcrnn_decoder_pallas, cheb_k=cheb_k))
    out, hidden = fwd(xt, init_state, support, params)
    out = jax.block_until_ready(out)

    ref_out, ref_hidden = adcrnn_decoder_ref(xt, init_state, [support], params,
                                             cheb_k=cheb_k)

    assert out.shape == (B, N, dim_out), out.shape
    err = float(jnp.max(jnp.abs(out - ref_out)))
    for h_p, h_r in zip(hidden, ref_hidden):
        err = max(err, float(jnp.max(jnp.abs(h_p - h_r))))
    assert np.isfinite(err) and err < 3e-3, f"max abs err {err}"
    print("KERNEL_OK")
</pallas_src>

<mosaic_0001>
module attributes {stable_mosaic.version = 11 : i64} {
  func.func @_decoder_kernel(%arg0: i32, %arg1: memref<2x16x4xf32, #tpu.memory_space<vmem>>, %arg2: memref<2x2x16x32xf32, #tpu.memory_space<vmem>>, %arg3: memref<2x16x16xbf16, #tpu.memory_space<vmem>>, %arg4: memref<108x64xbf16, #tpu.memory_space<vmem>>, %arg5: memref<1x64xf32, #tpu.memory_space<vmem>>, %arg6: memref<108x32xbf16, #tpu.memory_space<vmem>>, %arg7: memref<1x32xf32, #tpu.memory_space<vmem>>, %arg8: memref<192x64xbf16, #tpu.memory_space<vmem>>, %arg9: memref<1x64xf32, #tpu.memory_space<vmem>>, %arg10: memref<192x32xbf16, #tpu.memory_space<vmem>>, %arg11: memref<1x32xf32, #tpu.memory_space<vmem>>, %arg12: memref<2x2x512xf32, #tpu.memory_space<vmem>>) attributes {dimension_semantics = [#tpu.dimension_semantics<parallel>], iteration_bounds = array<i64: 1>, scalar_prefetch = 0 : i64, scratch_operands = 0 : i64, tpu.core_type = #tpu.core_type<tc>, window_params = [{transform_indices = @transform_0, window_bounds = array<i64: 2, 16, 4>}, {transform_indices = @transform_1, window_bounds = array<i64: 2, 2, 16, 32>}, {transform_indices = @transform_2, window_bounds = array<i64: 2, 16, 16>}, {pipeline_mode = #tpu.pipeline_mode<synchronous>, transform_indices = @transform_3, window_bounds = array<i64: 108, 64>}, {pipeline_mode = #tpu.pipeline_mode<synchronous>, transform_indices = @transform_4, window_bounds = array<i64: 1, 64>}, {pipeline_mode = #tpu.pipeline_mode<synchronous>, transform_indices = @transform_5, window_bounds = array<i64: 108, 32>}, {pipeline_mode = #tpu.pipeline_mode<synchronous>, transform_indices = @transform_6, window_bounds = array<i64: 1, 32>}, {pipeline_mode = #tpu.pipeline_mode<synchronous>, transform_indices = @transform_7, window_bounds = array<i64: 192, 64>}, {pipeline_mode = #tpu.pipeline_mode<synchronous>, transform_indices = @transform_8, window_bounds = array<i64: 1, 64>}, {pipeline_mode = #tpu.pipeline_mode<synchronous>, transform_indices = @transform_9, window_bounds = array<i64: 192, 32>}, {pipeline_mode = #tpu.pipeline_mode<synchronous>, transform_indices = @transform_10, window_bounds = array<i64: 1, 32>}, {transform_indices = @transform_11, window_bounds = array<i64: 2, 2, 512>}]} {
    %c0 = arith.constant 0 : index
    %c0_0 = arith.constant 0 : index
    %c0_1 = arith.constant 0 : index
    %0 = vector.load %arg3[%c0, %c0_0, %c0_1] : memref<2x16x16xbf16, #tpu.memory_space<vmem>>, vector<2x16x16xbf16>
    %1 = arith.addf %0, %0 : vector<2x16x16xbf16>
    %2 = tpu.iota {dimensions = array<i32: 0>} : vector<16x16xi32>
    %3 = tpu.iota {dimensions = array<i32: 1>} : vector<16x16xi32>
    %c0_i32 = arith.constant 0 : i32
    %4 = vector.broadcast %c0_i32 : i32 to vector<16x16xi32>
    %5 = arith.addi %2, %4 : vector<16x16xi32>
    %6 = arith.cmpi eq, %5, %3 : vector<16x16xi32>
    %7 = arith.extui %6 : vector<16x16xi1> to vector<16x16xi32>
    %8 = arith.sitofp %7 : vector<16x16xi32> to vector<16x16xf32>
    %9 = arith.extf %0 : vector<2x16x16xbf16> to vector<2x16x16xf32>
    %10 = arith.truncf %9 : vector<2x16x16xf32> to vector<2x16x16xbf16>
    %11 = vector.extract_strided_slice %1 {offsets = [0, 0, 0], sizes = [1, 16, 16], strides = [1, 1, 1]} : vector<2x16x16xbf16> to vector<1x16x16xbf16>
    %12 = vector.shape_cast %11 : vector<1x16x16xbf16> to vector<16x16xbf16>
    %13 = vector.extract_strided_slice %10 {offsets = [0, 0, 0], sizes = [1, 16, 16], strides = [1, 1, 1]} : vector<2x16x16xbf16> to vector<1x16x16xbf16>
    %14 = vector.shape_cast %13 : vector<1x16x16xbf16> to vector<16x16xbf16>
    %cst = arith.constant dense<0.000000e+00> : vector<16x16xf32>
    %15 = tpu.matmul %12, %14, %cst {dimension_numbers = #tpu.dot_dimension_numbers<[1], [0], [0], [1], [0, 0, 1, 1], [], []>} : vector<16x16xbf16>, vector<16x16xbf16>, vector<16x16xf32> -> vector<16x16xf32>
    %16 = vector.extract_strided_slice %1 {offsets = [1, 0, 0], sizes = [1, 16, 16], strides = [1, 1, 1]} : vector<2x16x16xbf16> to vector<1x16x16xbf16>
    %17 = vector.shape_cast %16 : vector<1x16x16xbf16> to vector<16x16xbf16>
    %18 = vector.extract_strided_slice %10 {offsets = [1, 0, 0], sizes = [1, 16, 16], strides = [1, 1, 1]} : vector<2x16x16xbf16> to vector<1x16x16xbf16>
    %19 = vector.shape_cast %18 : vector<1x16x16xbf16> to vector<16x16xbf16>
    %cst_2 = arith.constant dense<0.000000e+00> : vector<16x16xf32>
    %20 = tpu.matmul %17, %19, %cst_2 {dimension_numbers = #tpu.dot_dimension_numbers<[1], [0], [0], [1], [0, 0, 1, 1], [], []>} : vector<16x16xbf16>, vector<16x16xbf16>, vector<16x16xf32> -> vector<16x16xf32>
    %21 = vector.shape_cast %15 : vector<16x16xf32> to vector<1x16x16xf32>
    %22 = vector.shape_cast %20 : vector<16x16xf32> to vector<1x16x16xf32>
    %23 = tpu.concatenate %21, %22 in 0 : vector<1x16x16xf32>, vector<1x16x16xf32> -> vector<2x16x16xf32>
    %24 = vector.shape_cast %8 : vector<16x16xf32> to vector<1x16x16xf32>
    %25 = vector.broadcast %24 : vector<1x16x16xf32> to vector<2x16x16xf32>
    %26 = arith.subf %23, %25 : vector<2x16x16xf32>
    %27 = arith.truncf %26 : vector<2x16x16xf32> to vector<2x16x16xbf16>
    %c0_3 = arith.constant 0 : index
    %c0_4 = arith.constant 0 : index
    %c0_5 = arith.constant 0 : index
    %28 = vector.load %arg1[%c0_3, %c0_4, %c0_5] : memref<2x16x4xf32, #tpu.memory_space<vmem>>, vector<2x16x4xf32>
    %29 = arith.truncf %28 : vector<2x16x4xf32> to vector<2x16x4xbf16>
    %c0_6 = arith.constant 0 : index
    %c0_7 = arith.constant 0 : index
    %c0_8 = arith.constant 0 : index
    %c0_9 = arith.constant 0 : index
    %30 = vector.load %arg2[%c0_6, %c0_7, %c0_8, %c0_9] : memref<2x2x16x32xf32, #tpu.memory_space<vmem>>, vector<2x1x16x32xf32>
    %31 = vector.shape_cast %30 : vector<2x1x16x32xf32> to vector<2x16x32xf32>
    %32 = arith.truncf %31 : vector<2x16x32xf32> to vector<2x16x32xbf16>
    %33 = tpu.concatenate %29, %32 in 2 : vector<2x16x4xbf16>, vector<2x16x32xbf16> -> vector<2x16x36xbf16>
    %34 = vector.extract_strided_slice %0 {offsets = [0, 0, 0], sizes = [1, 16, 16], strides = [1, 1, 1]} : vector<2x16x16xbf16> to vector<1x16x16xbf16>
    %35 = vector.shape_cast %34 : vector<1x16x16xbf16> to vector<16x16xbf16>
    %36 = vector.extract_strided_slice %33 {offsets = [0, 0, 0], sizes = [1, 16, 36], strides = [1, 1, 1]} : vector<2x16x36xbf16> to vector<1x16x36xbf16>
    %37 = vector.shape_cast %36 : vector<1x16x36xbf16> to vector<16x36xbf16>
    %cst_10 = arith.constant dense<0.000000e+00> : vector<16x36xf32>
    %38 = tpu.matmul %35, %37, %cst_10 {dimension_numbers = #tpu.dot_dimension_numbers<[1], [0], [0], [1], [0, 0, 1, 1], [], []>} : vector<16x16xbf16>, vector<16x36xbf16>, vector<16x36xf32> -> vector<16x36xf32>
    %39 = vector.extract_strided_slice %0 {offsets = [1, 0, 0], sizes = [1, 16, 16], strides = [1, 1, 1]} : vector<2x16x16xbf16> to vector<1x16x16xbf16>
    %40 = vector.shape_cast %39 : vector<1x16x16xbf16> to vector<16x16xbf16>
    %41 = vector.extract_strided_slice %33 {offsets = [1, 0, 0], sizes = [1, 16, 36], strides = [1, 1, 1]} : vector<2x16x36xbf16> to vector<1x16x36xbf16>
    %42 = vector.shape_cast %41 : vector<1x16x36xbf16> to vector<16x36xbf16>
    %cst_11 = arith.constant dense<0.000000e+00> : vector<16x36xf32>
    %43 = tpu.matmul %40, %42, %cst_11 {dimension_numbers = #tpu.dot_dimension_numbers<[1], [0], [0], [1], [0, 0, 1, 1], [], []>} : vector<16x16xbf16>, vector<16x36xbf16>, vector<16x36xf32> -> vector<16x36xf32>
    %44 = vector.shape_cast %38 : vector<16x36xf32> to vector<1x16x36xf32>
    %45 = vector.shape_cast %43 : vector<16x36xf32> to vector<1x16x36xf32>
    %46 = tpu.concatenate %44, %45 in 0 : vector<1x16x36xf32>, vector<1x16x36xf32> -> vector<2x16x36xf32>
    %47 = arith.truncf %46 : vector<2x16x36xf32> to vector<2x16x36xbf16>
    %48 = vector.extract_strided_slice %27 {offsets = [0, 0, 0], sizes = [1, 16, 16], strides = [1, 1, 1]} : vector<2x16x16xbf16> to vector<1x16x16xbf16>
    %49 = vector.shape_cast %48 : vector<1x16x16xbf16> to vector<16x16xbf16>
    %50 = vector.extract_strided_slice %33 {offsets = [0, 0, 0], sizes = [1, 16, 36], strides = [1, 1, 1]} : vector<2x16x36xbf16> to vector<1x16x36xbf16>
    %51 = vector.shape_cast %50 : vector<1x16x36xbf16> to vector<16x36xbf16>
    %cst_12 = arith.constant dense<0.000000e+00> : vector<16x36xf32>
    %52 = tpu.matmul %49, %51, %cst_12 {dimension_numbers = #tpu.dot_dimension_numbers<[1], [0], [0], [1], [0, 0, 1, 1], [], []>} : vector<16x16xbf16>, vector<16x36xbf16>, vector<16x36xf32> -> vector<16x36xf32>
    %53 = vector.extract_strided_slice %27 {offsets = [1, 0, 0], sizes = [1, 16, 16], strides = [1, 1, 1]} : vector<2x16x16xbf16> to vector<1x16x16xbf16>
    %54 = vector.shape_cast %53 : vector<1x16x16xbf16> to vector<16x16xbf16>
    %55 = vector.extract_strided_slice %33 {offsets = [1, 0, 0], sizes = [1, 16, 36], strides = [1, 1, 1]} : vector<2x16x36xbf16> to vector<1x16x36xbf16>
    %56 = vector.shape_cast %55 : vector<1x16x36xbf16> to vector<16x36xbf16>
    %cst_13 = arith.constant dense<0.000000e+00> : vector<16x36xf32>
    %57 = tpu.matmul %54, %56, %cst_13 {dimension_numbers = #tpu.dot_dimension_numbers<[1], [0], [0], [1], [0, 0, 1, 1], [], []>} : vector<16x16xbf16>, vector<16x36xbf16>, vector<16x36xf32> -> vector<16x36xf32>
    %58 = vector.shape_cast %52 : vector<16x36xf32> to vector<1x16x36xf32>
    %59 = vector.shape_cast %57 : vector<16x36xf32> to vector<1x16x36xf32>
    %60 = tpu.concatenate %58, %59 in 0 : vector<1x16x36xf32>, vector<1x16x36xf32> -> vector<2x16x36xf32>
    %61 = arith.truncf %60 : vector<2x16x36xf32> to vector<2x16x36xbf16>
    %62 = tpu.concatenate %33, %47, %61 in 2 : vector<2x16x36xbf16>, vector<2x16x36xbf16>, vector<2x16x36xbf16> -> vector<2x16x108xbf16>
    %63 = vector.shape_cast %62 : vector<2x16x108xbf16> to vector<32x108xbf16>
    %c0_14 = arith.constant 0 : index
    %c0_15 = arith.constant 0 : index
    %64 = vector.load %arg4[%c0_14, %c0_15] : memref<108x64xbf16, #tpu.memory_space<vmem>>, vector<108x64xbf16>
    %cst_16 = arith.constant dense<0.000000e+00> : vector<32x64xf32>
    %65 = tpu.matmul %63, %64, %cst_16 {dimension_numbers = #tpu.dot_dimension_numbers<[1], [0], [0], [1], [0, 0, 1, 1], [], []>} : vector<32x108xbf16>, vector<108x64xbf16>, vector<32x64xf32> -> vector<32x64xf32>
    %c0_17 = arith.constant 0 : index
    %c0_18 = arith.constant 0 : index
    %66 = vector.load %arg5[%c0_17, %c0_18] : memref<1x64xf32, #tpu.memory_space<vmem>>, vector<1x64xf32>
    %67 = vector.broadcast %66 : vector<1x64xf32> to vector<32x64xf32>
    %68 = arith.addf %65, %67 : vector<32x64xf32>
    %69 = arith.negf %68 : vector<32x64xf32>
    %70 = math.exp %69 : vector<32x64xf32>
    %cst_19 = arith.constant 1.000000e+00 : f32
    %71 = vector.broadcast %cst_19 : f32 to vector<32x64xf32>
    %72 = arith.addf %71, %70 : vector<32x64xf32>
    %73 = arith.divf %71, %72 : vector<32x64xf32>
    %74 = vector.shape_cast %73 : vector<32x64xf32> to vector<2x16x64xf32>
    %75 = vector.extract_strided_slice %74 {offsets = [0, 0, 0], sizes = [2, 16, 32], strides = [1, 1, 1]} : vector<2x16x64xf32> to vector<2x16x32xf32>
    %76 = vector.extract_strided_slice %74 {offsets = [0, 0, 32], sizes = [2, 16, 32], strides = [1, 1, 1]} : vector<2x16x64xf32> to vector<2x16x32xf32>
    %77 = arith.mulf %75, %31 : vector<2x16x32xf32>
    %78 = arith.truncf %77 : vector<2x16x32xf32> to vector<2x16x32xbf16>
    %79 = vector.extract_strided_slice %0 {offsets = [0, 0, 0], sizes = [1, 16, 16], strides = [1, 1, 1]} : vector<2x16x16xbf16> to vector<1x16x16xbf16>
    %80 = vector.shape_cast %79 : vector<1x16x16xbf16> to vector<16x16xbf16>
    %81 = vector.extract_strided_slice %78 {offsets = [0, 0, 0], sizes = [1, 16, 32], strides = [1, 1, 1]} : vector<2x16x32xbf16> to vector<1x16x32xbf16>
    %82 = vector.shape_cast %81 : vector<1x16x32xbf16> to vector<16x32xbf16>
    %cst_20 = arith.constant dense<0.000000e+00> : vector<16x32xf32>
    %83 = tpu.matmul %80, %82, %cst_20 {dimension_numbers = #tpu.dot_dimension_numbers<[1], [0], [0], [1], [0, 0, 1, 1], [], []>} : vector<16x16xbf16>, vector<16x32xbf16>, vector<16x32xf32> -> vector<16x32xf32>
    %84 = vector.extract_strided_slice %0 {offsets = [1, 0, 0], sizes = [1, 16, 16], strides = [1, 1, 1]} : vector<2x16x16xbf16> to vector<1x16x16xbf16>
    %85 = vector.shape_cast %84 : vector<1x16x16xbf16> to vector<16x16xbf16>
    %86 = vector.extract_strided_slice %78 {offsets = [1, 0, 0], sizes = [1, 16, 32], strides = [1, 1, 1]} : vector<2x16x32xbf16> to vector<1x16x32xbf16>
    %87 = vector.shape_cast %86 : vector<1x16x32xbf16> to vector<16x32xbf16>
    %cst_21 = arith.constant dense<0.000000e+00> : vector<16x32xf32>
    %88 = tpu.matmul %85, %87, %cst_21 {dimension_numbers = #tpu.dot_dimension_numbers<[1], [0], [0], [1], [0, 0, 1, 1], [], []>} : vector<16x16xbf16>, vector<16x32xbf16>, vector<16x32xf32> -> vector<16x32xf32>
    %89 = vector.shape_cast %83 : vector<16x32xf32> to vector<1x16x32xf32>
    %90 = vector.shape_cast %88 : vector<16x32xf32> to vector<1x16x32xf32>
    %91 = tpu.concatenate %89, %90 in 0 : vector<1x16x32xf32>, vector<1x16x32xf32> -> vector<2x16x32xf32>
    %92 = arith.truncf %91 : vector<2x16x32xf32> to vector<2x16x32xbf16>
    %93 = vector.extract_strided_slice %27 {offsets = [0, 0, 0], sizes = [1, 16, 16], strides = [1, 1, 1]} : vector<2x16x16xbf16> to vector<1x16x16xbf16>
    %94 = vector.shape_cast %93 : vector<1x16x16xbf16> to vector<16x16xbf16>
    %95 = vector.extract_strided_slice %78 {offsets = [0, 0, 0], sizes = [1, 16, 32], strides = [1, 1, 1]} : vector<2x16x32xbf16> to vector<1x16x32xbf16>
    %96 = vector.shape_cast %95 : vector<1x16x32xbf16> to vector<16x32xbf16>
    %cst_22 = arith.constant dense<0.000000e+00> : vector<16x32xf32>
    %97 = tpu.matmul %94, %96, %cst_22 {dimension_numbers = #tpu.dot_dimension_numbers<[1], [0], [0], [1], [0, 0, 1, 1], [], []>} : vector<16x16xbf16>, vector<16x32xbf16>, vector<16x32xf32> -> vector<16x32xf32>
    %98 = vector.extract_strided_slice %27 {offsets = [1, 0, 0], sizes = [1, 16, 16], strides = [1, 1, 1]} : vector<2x16x16xbf16> to vector<1x16x16xbf16>
    %99 = vector.shape_cast %98 : vector<1x16x16xbf16> to vector<16x16xbf16>
    %100 = vector.extract_strided_slice %78 {offsets = [1, 0, 0], sizes = [1, 16, 32], strides = [1, 1, 1]} : vector<2x16x32xbf16> to vector<1x16x32xbf16>
    %101 = vector.shape_cast %100 : vector<1x16x32xbf16> to vector<16x32xbf16>
    %cst_23 = arith.constant dense<0.000000e+00> : vector<16x32xf32>
    %102 = tpu.matmul %99, %101, %cst_23 {dimension_numbers = #tpu.dot_dimension_numbers<[1], [0], [0], [1], [0, 0, 1, 1], [], []>} : vector<16x16xbf16>, vector<16x32xbf16>, vector<16x32xf32> -> vector<16x32xf32>
    %103 = vector.shape_cast %97 : vector<16x32xf32> to vector<1x16x32xf32>
    %104 = vector.shape_cast %102 : vector<16x32xf32> to vector<1x16x32xf32>
    %105 = tpu.concatenate %103, %104 in 0 : vector<1x16x32xf32>, vector<1x16x32xf32> -> vector<2x16x32xf32>
    %106 = arith.truncf %105 : vector<2x16x32xf32> to vector<2x16x32xbf16>
    %107 = vector.extract_strided_slice %47 {offsets = [0, 0, 0], sizes = [2, 16, 4], strides = [1, 1, 1]} : vector<2x16x36xbf16> to vector<2x16x4xbf16>
    %108 = vector.extract_strided_slice %61 {offsets = [0, 0, 0], sizes = [2, 16, 4], strides = [1, 1, 1]} : vector<2x16x36xbf16> to vector<2x16x4xbf16>
    %109 = tpu.concatenate %29, %78, %107, %92, %108, %106 in 2 : vector<2x16x4xbf16>, vector<2x16x32xbf16>, vector<2x16x4xbf16>, vector<2x16x32xbf16>, vector<2x16x4xbf16>, vector<2x16x32xbf16> -> vector<2x16x108xbf16>
    %110 = vector.shape_cast %109 : vector<2x16x108xbf16> to vector<32x108xbf16>
    %c0_24 = arith.constant 0 : index
    %c0_25 = arith.constant 0 : index
    %111 = vector.load %arg6[%c0_24, %c0_25] : memref<108x32xbf16, #tpu.memory_space<vmem>>, vector<108x32xbf16>
    %cst_26 = arith.constant dense<0.000000e+00> : vector<32x32xf32>
    %112 = tpu.matmul %110, %111, %cst_26 {dimension_numbers = #tpu.dot_dimension_numbers<[1], [0], [0], [1], [0, 0, 1, 1], [], []>} : vector<32x108xbf16>, vector<108x32xbf16>, vector<32x32xf32> -> vector<32x32xf32>
    %c0_27 = arith.constant 0 : index
    %c0_28 = arith.constant 0 : index
    %113 = vector.load %arg7[%c0_27, %c0_28] : memref<1x32xf32, #tpu.memory_space<vmem>>, vector<1x32xf32>
    %114 = vector.broadcast %113 : vector<1x32xf32> to vector<32x32xf32>
    %115 = arith.addf %112, %114 : vector<32x32xf32>
    %116 = math.tanh %115 : vector<32x32xf32>
    %117 = vector.shape_cast %116 : vector<32x32xf32> to vector<2x16x32xf32>
    %118 = arith.mulf %76, %31 : vector<2x16x32xf32>
    %cst_29 = arith.constant 1.000000e+00 : f32
    %119 = vector.broadcast %cst_29 : f32 to vector<2x16x32xf32>
    %120 = arith.subf %119, %76 : vector<2x16x32xf32>
    %121 = arith.mulf %120, %117 : vector<2x16x32xf32>
    %122 = arith.addf %118, %121 : vector<2x16x32xf32>
    %123 = vector.shape_cast %122 : vector<2x16x32xf32> to vector<2x512xf32>
    %c0_30 = arith.constant 0 : index
    %c0_31 = arith.constant 0 : index
    %c0_32 = arith.constant 0 : index
    %124 = vector.load %arg12[%c0_30, %c0_31, %c0_32] : memref<2x2x512xf32, #tpu.memory_space<vmem>>, vector<2x1x512xf32>
    %125 = vector.shape_cast %124 : vector<2x1x512xf32> to vector<2x512xf32>
    %126 = vector.shape_cast %123 : vector<2x512xf32> to vector<2x1x512xf32>
    tpu.vector_store %arg12[%c0_30, %c0_31, %c0_32], %126 {strides = array<i32>} : memref<2x2x512xf32, #tpu.memory_space<vmem>>, vector<2x1x512xf32>,
    %127 = arith.truncf %122 : vector<2x16x32xf32> to vector<2x16x32xbf16>
    %c0_33 = arith.constant 0 : index
    %c1 = arith.constant 1 : index
    %c0_34 = arith.constant 0 : index
    %c0_35 = arith.constant 0 : index
    %128 = vector.load %arg2[%c0_33, %c1, %c0_34, %c0_35] : memref<2x2x16x32xf32, #tpu.memory_space<vmem>>, vector<2x1x16x32xf32>
    %129 = vector.shape_cast %128 : vector<2x1x16x32xf32> to vector<2x16x32xf32>
    %130 = arith.truncf %129 : vector<2x16x32xf32> to vector<2x16x32xbf16>
    %131 = tpu.concatenate %127, %130 in 2 : vector<2x16x32xbf16>, vector<2x16x32xbf16> -> vector<2x16x64xbf16>
    %132 = vector.extract_strided_slice %0 {offsets = [0, 0, 0], sizes = [1, 16, 16], strides = [1, 1, 1]} : vector<2x16x16xbf16> to vector<1x16x16xbf16>
    %133 = vector.shape_cast %132 : vector<1x16x16xbf16> to vector<16x16xbf16>
    %134 = vector.extract_strided_slice %131 {offsets = [0, 0, 0], sizes = [1, 16, 64], strides = [1, 1, 1]} : vector<2x16x64xbf16> to vector<1x16x64xbf16>
    %135 = vector.shape_cast %134 : vector<1x16x64xbf16> to vector<16x64xbf16>
    %cst_36 = arith.constant dense<0.000000e+00> : vector<16x64xf32>
    %136 = tpu.matmul %133, %135, %cst_36 {dimension_numbers = #tpu.dot_dimension_numbers<[1], [0], [0], [1], [0, 0, 1, 1], [], []>} : vector<16x16xbf16>, vector<16x64xbf16>, vector<16x64xf32> -> vector<16x64xf32>
    %137 = vector.extract_strided_slice %0 {offsets = [1, 0, 0], sizes = [1, 16, 16], strides = [1, 1, 1]} : vector<2x16x16xbf16> to vector<1x16x16xbf16>
    %138 = vector.shape_cast %137 : vector<1x16x16xbf16> to vector<16x16xbf16>
    %139 = vector.extract_strided_slice %131 {offsets = [1, 0, 0], sizes = [1, 16, 64], strides = [1, 1, 1]} : vector<2x16x64xbf16> to vector<1x16x64xbf16>
    %140 = vector.shape_cast %139 : vector<1x16x64xbf16> to vector<16x64xbf16>
    %cst_37 = arith.constant dense<0.000000e+00> : vector<16x64xf32>
    %141 = tpu.matmul %138, %140, %cst_37 {dimension_numbers = #tpu.dot_dimension_numbers<[1], [0], [0], [1], [0, 0, 1, 1], [], []>} : vector<16x16xbf16>, vector<16x64xbf16>, vector<16x64xf32> -> vector<16x64xf32>
    %142 = vector.shape_cast %136 : vector<16x64xf32> to vector<1x16x64xf32>
    %143 = vector.shape_cast %141 : vector<16x64xf32> to vector<1x16x64xf32>
    %144 = tpu.concatenate %142, %143 in 0 : vector<1x16x64xf32>, vector<1x16x64xf32> -> vector<2x16x64xf32>
    %145 = arith.truncf %144 : vector<2x16x64xf32> to vector<2x16x64xbf16>
    %146 = vector.extract_strided_slice %27 {offsets = [0, 0, 0], sizes = [1, 16, 16], strides = [1, 1, 1]} : vector<2x16x16xbf16> to vector<1x16x16xbf16>
    %147 = vector.shape_cast %146 : vector<1x16x16xbf16> to vector<16x16xbf16>
    %148 = vector.extract_strided_slice %131 {offsets = [0, 0, 0], sizes = [1, 16, 64], strides = [1, 1, 1]} : vector<2x16x64xbf16> to vector<1x16x64xbf16>
    %149 = vector.shape_cast %148 : vector<1x16x64xbf16> to vector<16x64xbf16>
    %cst_38 = arith.constant dense<0.000000e+00> : vector<16x64xf32>
    %150 = tpu.matmul %147, %149, %cst_38 {dimension_numbers = #tpu.dot_dimension_numbers<[1], [0], [0], [1], [0, 0, 1, 1], [], []>} : vector<16x16xbf16>, vector<16x64xbf16>, vector<16x64xf32> -> vector<16x64xf32>
    %151 = vector.extract_strided_slice %27 {offsets = [1, 0, 0], sizes = [1, 16, 16], strides = [1, 1, 1]} : vector<2x16x16xbf16> to vector<1x16x16xbf16>
    %152 = vector.shape_cast %151 : vector<1x16x16xbf16> to vector<16x16xbf16>
    %153 = vector.extract_strided_slice %131 {offsets = [1, 0, 0], sizes = [1, 16, 64], strides = [1, 1, 1]} : vector<2x16x64xbf16> to vector<1x16x64xbf16>
    %154 = vector.shape_cast %153 : vector<1x16x64xbf16> to vector<16x64xbf16>
    %cst_39 = arith.constant dense<0.000000e+00> : vector<16x64xf32>
    %155 = tpu.matmul %152, %154, %cst_39 {dimension_numbers = #tpu.dot_dimension_numbers<[1], [0], [0], [1], [0, 0, 1, 1], [], []>} : vector<16x16xbf16>, vector<16x64xbf16>, vector<16x64xf32> -> vector<16x64xf32>
    %156 = vector.shape_cast %150 : vector<16x64xf32> to vector<1x16x64xf32>
    %157 = vector.shape_cast %155 : vector<16x64xf32> to vector<1x16x64xf32>
    %158 = tpu.concatenate %156, %157 in 0 : vector<1x16x64xf32>, vector<1x16x64xf32> -> vector<2x16x64xf32>
    %159 = arith.truncf %158 : vector<2x16x64xf32> to vector<2x16x64xbf16>
    %160 = tpu.concatenate %131, %145, %159 in 2 : vector<2x16x64xbf16>, vector<2x16x64xbf16>, vector<2x16x64xbf16> -> vector<2x16x192xbf16>
    %161 = vector.shape_cast %160 : vector<2x16x192xbf16> to vector<32x192xbf16>
    %c0_40 = arith.constant 0 : index
    %c0_41 = arith.constant 0 : index
    %162 = vector.load %arg8[%c0_40, %c0_41] : memref<192x64xbf16, #tpu.memory_space<vmem>>, vector<192x64xbf16>
    %cst_42 = arith.constant dense<0.000000e+00> : vector<32x64xf32>
    %163 = tpu.matmul %161, %162, %cst_42 {dimension_numbers = #tpu.dot_dimension_numbers<[1], [0], [0], [1], [0, 0, 1, 1], [], []>} : vector<32x192xbf16>, vector<192x64xbf16>, vector<32x64xf32> -> vector<32x64xf32>
    %c0_43 = arith.constant 0 : index
    %c0_44 = arith.constant 0 : index
    %164 = vector.load %arg9[%c0_43, %c0_44] : memref<1x64xf32, #tpu.memory_space<vmem>>, vector<1x64xf32>
    %165 = vector.broadcast %164 : vector<1x64xf32> to vector<32x64xf32>
    %166 = arith.addf %163, %165 : vector<32x64xf32>
    %167 = arith.negf %166 : vector<32x64xf32>
    %168 = math.exp %167 : vector<32x64xf32>
    %cst_45 = arith.constant 1.000000e+00 : f32
    %169 = vector.broadcast %cst_45 : f32 to vector<32x64xf32>
    %170 = arith.addf %169, %168 : vector<32x64xf32>
    %171 = arith.divf %169, %170 : vector<32x64xf32>
    %172 = vector.shape_cast %171 : vector<32x64xf32> to vector<2x16x64xf32>
    %173 = vector.extract_strided_slice %172 {offsets = [0, 0, 0], sizes = [2, 16, 32], strides = [1, 1, 1]} : vector<2x16x64xf32> to vector<2x16x32xf32>
    %174 = vector.extract_strided_slice %172 {offsets = [0, 0, 32], sizes = [2, 16, 32], strides = [1, 1, 1]} : vector<2x16x64xf32> to vector<2x16x32xf32>
    %175 = arith.mulf %173, %129 : vector<2x16x32xf32>
    %176 = arith.truncf %175 : vector<2x16x32xf32> to vector<2x16x32xbf16>
    %177 = vector.extract_strided_slice %0 {offsets = [0, 0, 0], sizes = [1, 16, 16], strides = [1, 1, 1]} : vector<2x16x16xbf16> to vector<1x16x16xbf16>
    %178 = vector.shape_cast %177 : vector<1x16x16xbf16> to vector<16x16xbf16>
    %179 = vector.extract_strided_slice %176 {offsets = [0, 0, 0], sizes = [1, 16, 32], strides = [1, 1, 1]} : vector<2x16x32xbf16> to vector<1x16x32xbf16>
    %180 = vector.shape_cast %179 : vector<1x16x32xbf16> to vector<16x32xbf16>
    %cst_46 = arith.constant dense<0.000000e+00> : vector<16x32xf32>
    %181 = tpu.matmul %178, %180, %cst_46 {dimension_numbers = #tpu.dot_dimension_numbers<[1], [0], [0], [1], [0, 0, 1, 1], [], []>} : vector<16x16xbf16>, vector<16x32xbf16>, vector<16x32xf32> -> vector<16x32xf32>
    %182 = vector.extract_strided_slice %0 {offsets = [1, 0, 0], sizes = [1, 16, 16], strides = [1, 1, 1]} : vector<2x16x16xbf16> to vector<1x16x16xbf16>
    %183 = vector.shape_cast %182 : vector<1x16x16xbf16> to vector<16x16xbf16>
    %184 = vector.extract_strided_slice %176 {offsets = [1, 0, 0], sizes = [1, 16, 32], strides = [1, 1, 1]} : vector<2x16x32xbf16> to vector<1x16x32xbf16>
    %185 = vector.shape_cast %184 : vector<1x16x32xbf16> to vector<16x32xbf16>
    %cst_47 = arith.constant dense<0.000000e+00> : vector<16x32xf32>
    %186 = tpu.matmul %183, %185, %cst_47 {dimension_numbers = #tpu.dot_dimension_numbers<[1], [0], [0], [1], [0, 0, 1, 1], [], []>} : vector<16x16xbf16>, vector<16x32xbf16>, vector<16x32xf32> -> vector<16x32xf32>
    %187 = vector.shape_cast %181 : vector<16x32xf32> to vector<1x16x32xf32>
    %188 = vector.shape_cast %186 : vector<16x32xf32> to vector<1x16x32xf32>
    %189 = tpu.concatenate %187, %188 in 0 : vector<1x16x32xf32>, vector<1x16x32xf32> -> vector<2x16x32xf32>
    %190 = arith.truncf %189 : vector<2x16x32xf32> to vector<2x16x32xbf16>
    %191 = vector.extract_strided_slice %27 {offsets = [0, 0, 0], sizes = [1, 16, 16], strides = [1, 1, 1]} : vector<2x16x16xbf16> to vector<1x16x16xbf16>
    %192 = vector.shape_cast %191 : vector<1x16x16xbf16> to vector<16x16xbf16>
    %193 = vector.extract_strided_slice %176 {offsets = [0, 0, 0], sizes = [1, 16, 32], strides = [1, 1, 1]} : vector<2x16x32xbf16> to vector<1x16x32xbf16>
    %194 = vector.shape_cast %193 : vector<1x16x32xbf16> to vector<16x32xbf16>
    %cst_48 = arith.constant dense<0.000000e+00> : vector<16x32xf32>
    %195 = tpu.matmul %192, %194, %cst_48 {dimension_numbers = #tpu.dot_dimension_numbers<[1], [0], [0], [1], [0, 0, 1, 1], [], []>} : vector<16x16xbf16>, vector<16x32xbf16>, vector<16x32xf32> -> vector<16x32xf32>
    %196 = vector.extract_strided_slice %27 {offsets = [1, 0, 0], sizes = [1, 16, 16], strides = [1, 1, 1]} : vector<2x16x16xbf16> to vector<1x16x16xbf16>
    %197 = vector.shape_cast %196 : vector<1x16x16xbf16> to vector<16x16xbf16>
    %198 = vector.extract_strided_slice %176 {offsets = [1, 0, 0], sizes = [1, 16, 32], strides = [1, 1, 1]} : vector<2x16x32xbf16> to vector<1x16x32xbf16>
    %199 = vector.shape_cast %198 : vector<1x16x32xbf16> to vector<16x32xbf16>
    %cst_49 = arith.constant dense<0.000000e+00> : vector<16x32xf32>
    %200 = tpu.matmul %197, %199, %cst_49 {dimension_numbers = #tpu.dot_dimension_numbers<[1], [0], [0], [1], [0, 0, 1, 1], [], []>} : vector<16x16xbf16>, vector<16x32xbf16>, vector<16x32xf32> -> vector<16x32xf32>
    %201 = vector.shape_cast %195 : vector<16x32xf32> to vector<1x16x32xf32>
    %202 = vector.shape_cast %200 : vector<16x32xf32> to vector<1x16x32xf32>
    %203 = tpu.concatenate %201, %202 in 0 : vector<1x16x32xf32>, vector<1x16x32xf32> -> vector<2x16x32xf32>
    %204 = arith.truncf %203 : vector<2x16x32xf32> to vector<2x16x32xbf16>
    %205 = vector.extract_strided_slice %145 {offsets = [0, 0, 0], sizes = [2, 16, 32], strides = [1, 1, 1]} : vector<2x16x64xbf16> to vector<2x16x32xbf16>
    %206 = vector.extract_strided_slice %159 {offsets = [0, 0, 0], sizes = [2, 16, 32], strides = [1, 1, 1]} : vector<2x16x64xbf16> to vector<2x16x32xbf16>
    %207 = tpu.concatenate %127, %176, %205, %190, %206, %204 in 2 : vector<2x16x32xbf16>, vector<2x16x32xbf16>, vector<2x16x32xbf16>, vector<2x16x32xbf16>, vector<2x16x32xbf16>, vector<2x16x32xbf16> -> vector<2x16x192xbf16>
    %208 = vector.shape_cast %207 : vector<2x16x192xbf16> to vector<32x192xbf16>
    %c0_50 = arith.constant 0 : index
    %c0_51 = arith.constant 0 : index
    %209 = vector.load %arg10[%c0_50, %c0_51] : memref<192x32xbf16, #tpu.memory_space<vmem>>, vector<192x32xbf16>
    %cst_52 = arith.constant dense<0.000000e+00> : vector<32x32xf32>
    %210 = tpu.matmul %208, %209, %cst_52 {dimension_numbers = #tpu.dot_dimension_numbers<[1], [0], [0], [1], [0, 0, 1, 1], [], []>} : vector<32x192xbf16>, vector<192x32xbf16>, vector<32x32xf32> -> vector<32x32xf32>
    %c0_53 = arith.constant 0 : index
    %c0_54 = arith.constant 0 : index
    %211 = vector.load %arg11[%c0_53, %c0_54] : memref<1x32xf32, #tpu.memory_space<vmem>>, vector<1x32xf32>
    %212 = vector.broadcast %211 : vector<1x32xf32> to vector<32x32xf32>
    %213 = arith.addf %210, %212 : vector<32x32xf32>
    %214 = math.tanh %213 : vector<32x32xf32>
    %215 = vector.shape_cast %214 : vector<32x32xf32> to vector<2x16x32xf32>
    %216 = arith.mulf %174, %129 : vector<2x16x32xf32>
    %cst_55 = arith.constant 1.000000e+00 : f32
    %217 = vector.broadcast %cst_55 : f32 to vector<2x16x32xf32>
    %218 = arith.subf %217, %174 : vector<2x16x32xf32>
    %219 = arith.mulf %218, %215 : vector<2x16x32xf32>
    %220 = arith.addf %216, %219 : vector<2x16x32xf32>
    %221 = vector.shape_cast %220 : vector<2x16x32xf32> to vector<2x512xf32>
    %c0_56 = arith.constant 0 : index
    %c1_57 = arith.constant 1 : index
    %c0_58 = arith.constant 0 : index
    %222 = vector.load %arg12[%c0_56, %c1_57, %c0_58] : memref<2x2x512xf32, #tpu.memory_space<vmem>>, vector<2x1x512xf32>
    %223 = vector.shape_cast %222 : vector<2x1x512xf32> to vector<2x512xf32>
    %224 = vector.shape_cast %221 : vector<2x512xf32> to vector<2x1x512xf32>
    tpu.vector_store %arg12[%c0_56, %c1_57, %c0_58], %224 {strides = array<i32>} : memref<2x2x512xf32, #tpu.memory_space<vmem>>, vector<2x1x512xf32>,
    return
  }
  func.func @transform_0(%arg0: i32) -> (i32, i32, i32) {
    %c0_i32 = arith.constant 0 : i32
    %c0_i32_0 = arith.constant 0 : i32
    %c0_i32_1 = arith.constant 0 : i32
    return %arg0, %c0_i32, %c0_i32_0 : i32, i32, i32
  }
  func.func @transform_1(%arg0: i32) -> (i32, i32, i32, i32) {
    %c0_i32 = arith.constant 0 : i32
    %c0_i32_0 = arith.constant 0 : i32
    %c0_i32_1 = arith.constant 0 : i32
    %c0_i32_2 = arith.constant 0 : i32
    return %arg0, %c0_i32, %c0_i32_0, %c0_i32_1 : i32, i32, i32, i32
  }
  func.func @transform_2(%arg0: i32) -> (i32, i32, i32) {
    %c0_i32 = arith.constant 0 : i32
    %c0_i32_0 = arith.constant 0 : i32
    %c0_i32_1 = arith.constant 0 : i32
    return %arg0, %c0_i32, %c0_i32_0 : i32, i32, i32
  }
  func.func @transform_3(%arg0: i32) -> (i32, i32) {
    %c0_i32 = arith.constant 0 : i32
    %c0_i32_0 = arith.constant 0 : i32
    %c0_i32_1 = arith.constant 0 : i32
    return %c0_i32, %c0_i32_0 : i32, i32
  }
  func.func @transform_4(%arg0: i32) -> (i32, i32) {
    %c0_i32 = arith.constant 0 : i32
    %c0_i32_0 = arith.constant 0 : i32
    %c0_i32_1 = arith.constant 0 : i32
    return %c0_i32, %c0_i32_0 : i32, i32
  }
  func.func @transform_5(%arg0: i32) -> (i32, i32) {
    %c0_i32 = arith.constant 0 : i32
    %c0_i32_0 = arith.constant 0 : i32
    %c0_i32_1 = arith.constant 0 : i32
    return %c0_i32, %c0_i32_0 : i32, i32
  }
  func.func @transform_6(%arg0: i32) -> (i32, i32) {
    %c0_i32 = arith.constant 0 : i32
    %c0_i32_0 = arith.constant 0 : i32
    %c0_i32_1 = arith.constant 0 : i32
    return %c0_i32, %c0_i32_0 : i32, i32
  }
  func.func @transform_7(%arg0: i32) -> (i32, i32) {
    %c0_i32 = arith.constant 0 : i32
    %c0_i32_0 = arith.constant 0 : i32
    %c0_i32_1 = arith.constant 0 : i32
    return %c0_i32, %c0_i32_0 : i32, i32
  }
  func.func @transform_8(%arg0: i32) -> (i32, i32) {
    %c0_i32 = arith.constant 0 : i32
    %c0_i32_0 = arith.constant 0 : i32
    %c0_i32_1 = arith.constant 0 : i32
    return %c0_i32, %c0_i32_0 : i32, i32
  }
  func.func @transform_9(%arg0: i32) -> (i32, i32) {
    %c0_i32 = arith.constant 0 : i32
    %c0_i32_0 = arith.constant 0 : i32
    %c0_i32_1 = arith.constant 0 : i32
    return %c0_i32, %c0_i32_0 : i32, i32
  }
  func.func @transform_10(%arg0: i32) -> (i32, i32) {
    %c0_i32 = arith.constant 0 : i32
    %c0_i32_0 = arith.constant 0 : i32
    %c0_i32_1 = arith.constant 0 : i32
    return %c0_i32, %c0_i32_0 : i32, i32
  }
  func.func @transform_11(%arg0: i32) -> (i32, i32, i32) {
    %c0_i32 = arith.constant 0 : i32
    %c0_i32_0 = arith.constant 0 : i32
    %c0_i32_1 = arith.constant 0 : i32
    return %arg0, %c0_i32, %c0_i32_0 : i32, i32, i32
  }
}

</mosaic_0001>

<bundles_post_ra>
// kernel: adcrnn_decoder_pallas.1
= control target key start
LH: loop header
LB: loop body
LE: loop exit
PB: predicated region body
PF: predicated region fallthrough
CT: control target
= control target key end

     0   :  { %v2924_v0 = vmov 0.0   ;;  %vm2925_vm0 = vmmov 0   ;;  %vm69_vm1 = vcmask 130048   ;;  %s2926_s14 = smov 4   ;;  %vm193_vm2 = vcmask 31744   ;;  %s2927_s27 = smov 36   ;;  %s3888_s2 = inlined_call_operand.vmem [shape: bf16[2,16,16], index: 2, kind: input, shape index: {}]   ;;  %s3889_s1 = inlined_call_operand.vmem [shape: f32[2,2,16,32], index: 1, kind: input, shape index: {}]   ;;  %s3890_s0 = inlined_call_operand.vmem [shape: f32[2,16,4], index: 0, kind: input, shape index: {}]   ;;  %s3891_s3 = inlined_call_operand.vmem [shape: bf16[108,64], index: 3, kind: input, shape index: {}]   ;;  %s3892_s4 = inlined_call_operand.vmem [shape: f32[1,64], index: 4, kind: input, shape index: {}]   ;;  %s3893_s5 = inlined_call_operand.vmem [shape: bf16[108,32], index: 5, kind: input, shape index: {}]   ;;  %s3894_s6 = inlined_call_operand.vmem [shape: f32[1,32], index: 6, kind: input, shape index: {}]   ;;  %s3895_s7 = inlined_call_operand.vmem [shape: bf16[192,64], index: 7, kind: input, shape index: {}]   ;;  %s3896_s8 = inlined_call_operand.vmem [shape: f32[1,64], index: 8, kind: input, shape index: {}]   ;;  %s3897_s9 = inlined_call_operand.vmem [shape: bf16[192,32], index: 9, kind: input, shape index: {}]   ;;  %s3898_s10 = inlined_call_operand.vmem [shape: f32[1,32], index: 10, kind: input, shape index: {}]   ;;  %s3899_s11 = inlined_call_operand.vmem [shape: f32[2,2,512], index: 11, kind: output, shape index: {}]  }
   0x1   :  { %2676 = vmatprep.subr.bf16.mxu0 %v2924_v0  ;;  %v39_v1 = vld [vmem:[%s3888_s2] sm:$0xf]  ;;  %v40_v2 = vld [vmem:[%s3888_s2 + $0x4] sm:$0xf]  ;;  %2678 = vmatprep.mubr.msk.bf16.mxu0 %vm2925_vm0, %v2924_v0  ;;  %v3017_v5 = vld [vmem:[%s3889_s1 + $0x8] sm:$0xff]  ;;  %v47_v29 = vlaneseq  ;;  %vm471_vm5 = vcmask 1045504  }
   0x2   :  { %v3008_v3 = vld [vmem:[%s3889_s1] sm:$0xff]  ;;  %v3012_v4 = vcombine.low %v39_v1, %v40_v2  ;;  %v43_v6 = vadd.bf16 %v39_v1, %v39_v1  ;;  %v44_v7 = vadd.bf16 %v40_v2, %v40_v2  ;;  %v3027_v9 = vld [vmem:[%s3889_s1 + $0x28] sm:$0xff]  ;;  %2694 = vmatprep.subr.bf16.mxu1 %v2924_v0  ;;  %2696 = vmatprep.mubr.msk.bf16.mxu1 %vm2925_vm0, %v2924_v0  ;;  %v177_v22 = vld [vmem:[%s3890_s0 + $0x10] sm:$0xff]  ;;  %s2928_s17 = smov 72   ;;  %vm394_vm6 = vcmask 293888   ;;  %s2929_s26 = smov 40  }
   0x3   :  { %v3022_v8 = vld [vmem:[%s3889_s1 + $0x20] sm:$0xff]  ;;  %v185_v10 = vpack.c.bf16 %v3017_v5, %v3008_v3  ;;  %v41_v11 = vld [vmem:[%s3888_s2 + $0x8] sm:$0xf]  ;;  %v42_v12 = vld [vmem:[%s3888_s2 + $0xc] sm:$0xf]  ;;  %v3095_v30 = vshrl.u32 %v47_v29, 7 }
   0x4   :  { %2677 = vmatpush3.bf16.msra.mxu0 %v3012_v4  ;;  %v2535_v13 = vcombine.low %v43_v6, %v44_v7  ;;  %v3041_v14 = vcombine.low %v41_v11, %v42_v12  ;;  %v186_v15 = vpack.c.bf16 %v3027_v9, %v3022_v8  ;;  %v45_v16 = vadd.bf16 %v41_v11, %v41_v11  ;;  %v175_v19 = vld [vmem:[%s3890_s0] sm:$0xff]  ;;  %v176_v20 = vld [vmem:[%s3890_s0 + $0x8] sm:$0xff]  ;;  %v178_v23 = vld [vmem:[%s3890_s0 + $0x18] sm:$0xff]  ;;  %s2930_s12 = smov 76   ;;  %s2931_s13 = smov 32  }
   0x5   :  { %189 = vrot.lane.b32.xlu0 %v185_v10, %s2926_s14  ;;  %2682 = vmatprep.subr.bf16.mxu0 %v2924_v0  ;;  %v46_v17 = vadd.bf16 %v42_v12, %v42_v12  ;;  %v3062_v21 = vpack.c.bf16 %v176_v20, %v175_v19  ;;  %v3074_v26 = vpack.c.bf16 %v178_v23, %v177_v22  ;;  %v51_v31 = vand.u32 127, %v47_v29  ;;  %v2838_v49 = vld [vmem:[%s3891_s3 + $0x30] sm:$0x3f]   ;;  %v2839_v51 = vld [vmem:[%s3891_s3 + $0x28] sm:$0xff]   ;;  %v2840_v54 = vld [vmem:[%s3891_s3 + $0x20] sm:$0xff]   ;;  %s2934_s19 = smov 64  }
   0x6   :  { %v49_v32 = vadd.s32 8, %v3095_v30  ;;  %v473_v52 = vsel %vm471_vm5, %v2838_v49, 0  ;;  %v2841_v60 = vld [vmem:[%s3891_s3 + $0x18] sm:$0xff]   ;;  %v2842_v1 = vld [vmem:[%s3891_s3 + $0x10] sm:$0xff]   ;;  %v2843_v2 = vld [vmem:[%s3891_s3 + $0x8] sm:$0xff]   ;;  %vm399_vm7 = vcmask 588800  }
   0x7   :  { %2679 = vmatmul.mubr.msk.bf16.vlgmr.msra.gmra.mxu0 %vm69_vm1, %v2535_v13  ;;  %v2538_v18 = vcombine.low %v45_v16, %v46_v17  ;;  %vm52_vm3 = vcmp.eq.s32.totalorder %v3095_v30, %v51_v31  ;;  %v2844_v6 = vld [vmem:[%s3891_s3] sm:$0xff]   ;;  %vm466_vm8 = vcmask 883712   ;;  %vm746_vm9 = vcmask 326656  }
   0x8   :  { %2683 = vmatpush3.bf16.msra.mxu0 %v3041_v14  ;;  %2684 = vmatprep.mubr.msk.bf16.mxu0 %vm2925_vm0, %v2924_v0  ;;  %vm53_vm4 = vcmp.eq.s32.totalorder %v49_v32, %v51_v31  ;;  %v2533_v34 = vsel %vm52_vm3, 1.0, %v2924_v0  ;;  %vm753_vm10 = vcmask 621568   ;;  %vm1236_vm11 = vcmask 261120  }
   0x9   :  { %191 = vrot.lane.b32.xlu0 %v186_v15, %s2926_s14  ;;  %2688 = vmatprep.subr.bf16.mxu0 %v2924_v0  ;;  %v2534_v36 = vsel %vm53_vm4, 1.0, %v2924_v0  ;;  %vm1239_vm12 = vcmask 523264   ;;  %vm1242_vm13 = vcmask 785408   ;;  %vm3790_vm14 = vcmp.lt.s32.totalorder %v47_v29, 512 }
   0xf   :  { %2685 = vmatmul.mubr.msk.bf16.vlgmr.msra.gmra.mxu0 %vm69_vm1, %v2538_v18 }
  0x10   :  { %2690 = vmatprep.mubr.msk.bf16.mxu0 %vm2925_vm0, %v2924_v0 }
  0x77   :  { %v190_v24 = vpop.permute.xlu0 %189 }
  0x78   :  { %v3072_v25 = vsel %vm193_vm2, %v3062_v21, %v190_v24 }
  0x79   :  { %2689 = vmatpush3.bf16.msra.mxu0 %v3072_v25 }
  0x7a   :  { %2700 = vmatprep.subr.bf16.mxu0 %v2924_v0 }
  0x7b   :  { %v192_v27 = vpop.permute.xlu0 %191 }
  0x7c   :  { %2691 = vmatmul.mubr.msk.bf16.vlgmr.msra.gmra.mxu0 %vm69_vm1, %v3012_v4  ;;  %v3082_v28 = vsel %vm193_vm2, %v3074_v26, %v192_v27 }
  0x7d   :  { %2695 = vmatpush3.bf16.msra.mxu1 %v3082_v28  ;;  %2701 = vmatpush3.bf16.msra.mxu0 %v3072_v25 }
  0x7e   :  { %2706 = vmatprep.subr.bf16.mxu1 %v2924_v0  ;;  %2702 = vmatprep.mubr.msk.bf16.mxu0 %vm2925_vm0, %v2924_v0 }
  0x80   :  { %2697 = vmatmul.mubr.msk.bf16.vlgmr.msra.gmra.mxu1 %vm69_vm1, %v3041_v14 }
  0x81   :  { %2707 = vmatpush3.bf16.msra.mxu1 %v3082_v28  ;;  %2708 = vmatprep.mubr.msk.bf16.mxu1 %vm2925_vm0, %v2924_v0 }
  0x82   :  { %2820 = vmatprep.subr.msk.bf16.mxu1 %vm471_vm5, %v2838_v49 }
  0xc7   :  { %v107_v33 = vpop.f32.mrf.mxu0 }
  0xc8   :  { %v169_v38 = vsub.f32 %v107_v33, %v2533_v34 }
  0xc9   :  { %v2680_v35 = vpop.f32.mrf.mxu0 }
  0xcb   :  { %v110_v37 = vpop.f32.mrf.mxu0 }
  0xcc   :  { %v170_v39 = vsub.f32 %v110_v37, %v2534_v36 }
  0xcd   :  { %v2681_v40 = vpop.f32.mrf.mxu0 }
  0xce   :  { %v3102_v41 = vpack.c.bf16 %v170_v39, %v169_v38 }
  0xcf   :  { %v162_v42 = vpop.f32.mrf.mxu0 }
  0xd0   :  { %2703 = vmatmul.mubr.msk.bf16.vlgmr.msra.gmra.mxu0 %vm69_vm1, %v3102_v41  ;;  %v171_v45 = vsub.f32 %v162_v42, %v2533_v34 }
  0xd1   :  { %v2686_v43 = vpop.f32.mrf.mxu0 }
  0xd3   :  { %v165_v44 = vpop.f32.mrf.mxu0 }
  0xd4   :  { %v172_v46 = vsub.f32 %v165_v44, %v2534_v36 }
  0xd5   :  { %v2687_v47 = vpop.f32.mrf.mxu0 }
  0xd6   :  { %v3106_v48 = vpack.c.bf16 %v172_v46, %v171_v45 }
  0xd8   :  { %2709 = vmatmul.mubr.msk.bf16.vlgmr.msra.gmra.mxu1 %vm69_vm1, %v3106_v48 }
  0xd9   :  { %2713 = vmatpush3.bf16.msra.mxu1 %v473_v52 }
  0xda   :  { %2714 = vmatprep.subr.bf16.mxu1 %v2839_v51 }
  0xdd   :  { %2715 = vmatpush3.bf16.msra.mxu1 %v2839_v51 }
  0xde   :  { %2716 = vmatprep.subr.bf16.mxu1 %v2840_v54 }
  0xe1   :  { %2717 = vmatpush3.bf16.msra.mxu1 %v2840_v54 }
  0xe2   :  { %2718 = vmatprep.subr.bf16.mxu1 %v2841_v60 }
  0xe5   :  { %2719 = vmatpush3.bf16.msra.mxu1 %v2841_v60 }
  0xe6   :  { %2720 = vmatprep.subr.bf16.mxu1 %v2842_v1 }
  0xe9   :  { %2721 = vmatpush3.bf16.msra.mxu1 %v2842_v1 }
  0xea   :  { %2722 = vmatprep.subr.bf16.mxu1 %v2843_v2 }
  0xed   :  { %2723 = vmatpush3.bf16.msra.mxu1 %v2843_v2  ;;  %v2845_v2 = vld [vmem:[%s3893_s5 + $0x30] sm:$0x3f]  }
  0xee   :  { %2724 = vmatprep.subr.bf16.mxu1 %v2844_v6  ;;  %2821 = vmatprep.subr.msk.bf16.mxu0 %vm471_vm5, %v2845_v2 }
  0xf1   :  { %2725 = vmatpush3.bf16.msra.mxu1 %v2844_v6  ;;  %v825_v6 = vsel %vm471_vm5, %v2845_v2, 0 }
  0xf2   :  { %2730 = vmatprep.subr.bf16.mxu1 %v2924_v0  ;;  %2755 = vmatpush3.bf16.msra.mxu0 %v825_v6 }
 0x13c   :  { %v239_v50 = vpop.f32.mrf.mxu0 }
 0x13e   :  { %v2692_v53 = vpop.f32.mrf.mxu0 }
 0x140   :  { %v242_v55 = vpop.f32.mrf.mxu0  ;;  %v283_v56 = vpop.f32.mrf.mxu1 }
 0x141   :  { %v290_v57 = vpack.c.bf16 %v242_v55, %v239_v50 }
 0x142   :  { %v2698_v58 = vpop.f32.mrf.mxu1  ;;  %v2693_v59 = vpop.f32.mrf.mxu0 }
 0x143   :  { %384 = vrot.lane.b32.xlu1 %v290_v57, %s2927_s27 }
 0x144   :  { %v286_v61 = vpop.f32.mrf.mxu1 }
 0x145   :  { %v291_v62 = vpack.c.bf16 %v286_v61, %v283_v56 }
 0x146   :  { %v2699_v63 = vpop.f32.mrf.mxu1 }
 0x147   :  { %386 = vrot.lane.b32.xlu1 %v291_v62, %s2927_s27 }
 0x190   :  { %v329_v7 = vpop.f32.mrf.mxu0 }
 0x192   :  { %v2704_v10 = vpop.f32.mrf.mxu0 }
 0x193   :  { %v2847_v10 = vld [vmem:[%s3893_s5 + $0x20] sm:$0xff]  }
 0x194   :  { %v332_v11 = vpop.f32.mrf.mxu0 }
 0x195   :  { %v380_v12 = vpack.c.bf16 %v332_v11, %v329_v7  ;;  %v2846_v7 = vld [vmem:[%s3893_s5 + $0x28] sm:$0xff]  }
 0x196   :  { %v2705_v13 = vpop.f32.mrf.mxu0  ;;  %2756 = vmatprep.subr.bf16.mxu0 %v2846_v7 }
 0x197   :  { %390 = vrot.lane.b32.xlu0 %v380_v12, %s2928_s17  ;;  %2757 = vmatpush3.bf16.msra.mxu0 %v2846_v7  ;;  %v2848_v13 = vld [vmem:[%s3893_s5 + $0x18] sm:$0xff]  }
 0x198   :  { %v373_v15 = vpop.f32.mrf.mxu1  ;;  %2758 = vmatprep.subr.bf16.mxu0 %v2847_v10 }
 0x19a   :  { %v2710_v16 = vpop.f32.mrf.mxu1 }
 0x19b   :  { %2759 = vmatpush3.bf16.msra.mxu0 %v2847_v10 }
 0x19c   :  { %v376_v17 = vpop.f32.mrf.mxu1  ;;  %2760 = vmatprep.subr.bf16.mxu0 %v2848_v13 }
 0x19d   :  { %v381_v18 = vpack.c.bf16 %v376_v17, %v373_v15  ;;  %v2849_v15 = vld [vmem:[%s3893_s5 + $0x10] sm:$0xff]  }
 0x19e   :  { %v2711_v19 = vpop.f32.mrf.mxu1 }
 0x19f   :  { %392 = vrot.lane.b32.xlu1 %v381_v18, %s2928_s17  ;;  %2761 = vmatpush3.bf16.msra.mxu0 %v2848_v13  ;;  %v3259_v13 = vld [vmem:[%s3889_s1 + $0x18] sm:$0xff] }
 0x1a0   :  { %2762 = vmatprep.subr.bf16.mxu0 %v2849_v15 }
 0x1a3   :  { %2763 = vmatpush3.bf16.msra.mxu0 %v2849_v15 }
 0x1b5   :  { %v3134_v20 = vpop.permute.xlu1 %384 }
 0x1b6   :  { %v396_v22 = vsel %vm394_vm6, %v3072_v25, %v3134_v20  ;;  %v2545_v25 = vld [vmem:[%s3892_s4] ss:$0 sm:$0xff] }
 0x1b9   :  { %v3144_v27 = vpop.permute.xlu1 %386 }
 0x1ba   :  { %v398_v31 = vsel %vm394_vm6, %v3082_v28, %v3144_v27 }
 0x209   :  { %v3139_v23 = vpop.permute.xlu0 %390 }
 0x20a   :  { %v401_v24 = vsel %vm399_vm7, %v396_v22, %v3139_v23 }
 0x20b   :  { %2726 = vmatprep.mubr.msk.bf16.mxu1 %vm466_vm8, %v401_v24  ;;  %v2850_v24 = vld [vmem:[%s3893_s5 + $0x8] sm:$0xff]  }
 0x20c   :  { %2764 = vmatprep.subr.bf16.mxu0 %v2850_v24 }
 0x20d   :  { %2765 = vmatpush3.bf16.msra.mxu0 %v2850_v24 }
 0x211   :  { %v3149_v32 = vpop.permute.xlu1 %392 }
 0x212   :  { %v403_v33 = vsel %vm399_vm7, %v398_v31, %v3149_v32 }
 0x213   :  { %2727 = vmatmul.mubr.msk.bf16.vlgmr.msra.gmra.mxu1 %vm466_vm8, %v403_v33 }
 0x214   :  { %2732 = vmatprep.mubr.msk.bf16.mxu1 %vm2925_vm0, %v2924_v0 }
 0x2d3   :  { %v2728_v34 = vpop.f32.mrf.mxu1 }
 0x2d4   :  { %v518_v35 = vadd.f32 %v2728_v34, %v2545_v25  ;;  %v2851_v34 = vld [vmem:[%s3893_s5] sm:$0xff]  }
 0x2d5   :  { %v509_v36 = vpop.f32.mrf.mxu1  ;;  %2766 = vmatprep.subr.bf16.mxu0 %v2851_v34 }
 0x2d6   :  { %v2557_v37 = vmul.f32 -1.442695, %v518_v35  ;;  %v510_v38 = vadd.f32 %v2545_v25, %v509_v36  ;;  %2767 = vmatpush3.bf16.msra.mxu0 %v2851_v34 }
 0x2d7   :  { %v2729_v28 = vpop.f32.mrf.mxu1  ;;  %2790 = vmatprep.subr.bf16.mxu0 %v2924_v0 }
 0x2d8   :  { %2876 = vpow2.f32 %v2557_v37  ;;  %v2555_v39 = vmul.f32 -1.442695, %v510_v38  ;;  %v521_v40 = vadd.f32 %v2729_v28, %v2545_v25 }
 0x2d9   :  { %v512_v42 = vpop.f32.mrf.mxu1 }
 0x2da   :  { %2878 = vpow2.f32 %v2555_v39  ;;  %v2558_v43 = vmul.f32 -1.442695, %v521_v40  ;;  %v513_v44 = vadd.f32 %v2545_v25, %v512_v42 }
 0x2dc   :  { %2880 = vpow2.f32 %v2558_v43  ;;  %v2556_v45 = vmul.f32 -1.442695, %v513_v44 }
 0x2de   :  { %2882 = vpow2.f32 %v2556_v45 }
 0x2e5   :  { %v2877_v46 = vpop.eup %2876 }
 0x2e6   :  { %v538_v47 = vadd.f32 1.0, %v2877_v46 }
 0x2e7   :  { %v2879_v49 = vpop.eup %2878 }
 0x2e8   :  { %v536_v50 = vadd.f32 1.0, %v2879_v49  ;;  %2884 = vrcp.f32 %v538_v47 }
 0x2e9   :  { %v2881_v51 = vpop.eup %2880 }
 0x2ea   :  { %v539_v52 = vadd.f32 1.0, %v2881_v51  ;;  %2886 = vrcp.f32 %v536_v50 }
 0x2eb   :  { %v2883_v53 = vpop.eup %2882 }
 0x2ec   :  { %2888 = vrcp.f32 %v539_v52  ;;  %v537_v54 = vadd.f32 1.0, %v2883_v53 }
 0x2ee   :  { %2890 = vrcp.f32 %v537_v54 }
 0x2f5   :  { %v3159_v55 = vpop.eup %2884 }
 0x2f6   :  { %v550_v58 = vmul.f32 %v3159_v55, %v3022_v8 }
 0x2f7   :  { %v3161_v56 = vpop.eup %2886 }
 0x2f8   :  { %v548_v62 = vmul.f32 %v3161_v56, %v3008_v3  ;;  %v900_v24 = vsub.f32 1.0, %v3161_v56 }
 0x2f9   :  { %v3163_v57 = vpop.eup %2888 }
 0x2fa   :  { %v551_v59 = vmul.f32 %v3163_v57, %v3027_v9 }
 0x2fb   :  { %v3169_v60 = vpop.eup %2890 }
 0x2fc   :  { %v553_v61 = vpack.c.bf16 %v551_v59, %v550_v58  ;;  %v549_v63 = vmul.f32 %v3169_v60, %v3017_v5 }
 0x2fe   :  { %726 = vrot.lane.b32.xlu1 %v553_v61, %s2926_s14  ;;  %v552_v1 = vpack.c.bf16 %v549_v63, %v548_v62 }
 0x300   :  { %724 = vrot.lane.b32.xlu0 %v552_v1, %s2926_s14  ;;  %2731 = vmatpush3.bf16.msra.mxu1 %v552_v1 }
 0x301   :  { %2736 = vmatprep.subr.bf16.mxu1 %v2924_v0 }
 0x303   :  { %2733 = vmatmul.mubr.msk.bf16.vlgmr.msra.gmra.mxu1 %vm69_vm1, %v3012_v4 }
 0x304   :  { %2737 = vmatpush3.bf16.msra.mxu1 %v553_v61  ;;  %2738 = vmatprep.mubr.msk.bf16.mxu1 %vm2925_vm0, %v2924_v0 }
 0x305   :  { %2742 = vmatprep.subr.bf16.mxu1 %v2924_v0 }
 0x30b   :  { %2739 = vmatmul.mubr.msk.bf16.vlgmr.msra.gmra.mxu1 %vm69_vm1, %v3041_v14 }
 0x30c   :  { %2743 = vmatpush3.bf16.msra.mxu1 %v552_v1  ;;  %2744 = vmatprep.mubr.msk.bf16.mxu1 %vm2925_vm0, %v2924_v0 }
 0x30d   :  { %2748 = vmatprep.subr.bf16.mxu1 %v2924_v0 }
 0x313   :  { %2745 = vmatmul.mubr.msk.bf16.vlgmr.msra.gmra.mxu1 %vm69_vm1, %v3102_v41 }
 0x314   :  { %2749 = vmatpush3.bf16.msra.mxu1 %v553_v61  ;;  %2750 = vmatprep.mubr.msk.bf16.mxu1 %vm2925_vm0, %v2924_v0 }
 0x315   :  { %2772 = vmatprep.subr.bf16.mxu1 %v2924_v0 }
 0x31b   :  { %2751 = vmatmul.mubr.msk.bf16.vlgmr.msra.gmra.mxu1 %vm69_vm1, %v3106_v48 }
 0x31c   :  { %2774 = vmatprep.mubr.msk.bf16.mxu1 %vm2925_vm0, %v2924_v0 }
 0x370   :  { %v727_v51 = vpop.permute.xlu1 %726 }
 0x371   :  { %v743_v53 = vsel %vm193_vm2, %v3074_v26, %v727_v51  ;;  %v2563_v26 = vld [vmem:[%s3894_s6] ss:$0 sm:$0xff] }
 0x372   :  { %v725_v45 = vpop.permute.xlu0 %724 }
 0x373   :  { %v741_v46 = vsel %vm193_vm2, %v3062_v21, %v725_v45  ;;  %v745_v21 = vsel %vm394_vm6, %v743_v53, %v3144_v27 }
 0x374   :  { %v744_v49 = vsel %vm394_vm6, %v741_v46, %v3134_v20 }
 0x3c3   :  { %v588_v11 = vpop.f32.mrf.mxu1 }
 0x3c5   :  { %v2734_v12 = vpop.f32.mrf.mxu1 }
 0x3c6   :  { %v3254_v12 = vld [vmem:[%s3889_s1 + $0x10] sm:$0xff] }
 0x3c7   :  { %v591_v16 = vpop.f32.mrf.mxu1 }
 0x3c8   :  { %v636_v17 = vpack.c.bf16 %v591_v16, %v588_v11  ;;  %v3272_v16 = vld [vmem:[%s3889_s1 + $0x38] sm:$0xff] }
 0x3c9   :  { %v2735_v18 = vpop.f32.mrf.mxu1 }
 0x3ca   :  { %730 = vrot.lane.b32.xlu0 %v636_v17, %s2929_s26 }
 0x3cb   :  { %v629_v19 = vpop.f32.mrf.mxu1 }
 0x3cd   :  { %v2740_v22 = vpop.f32.mrf.mxu1 }
 0x3cf   :  { %v632_v31 = vpop.f32.mrf.mxu1 }
 0x3d0   :  { %v637_v33 = vpack.c.bf16 %v632_v31, %v629_v19 }
 0x3d1   :  { %v2741_v25 = vpop.f32.mrf.mxu1 }
 0x3d2   :  { %732 = vrot.lane.b32.xlu1 %v637_v33, %s2929_s26  ;;  %v901_v33 = vsub.f32 1.0, %v3169_v60 }
 0x3d3   :  { %v672_v35 = vpop.f32.mrf.mxu1 }
 0x3d5   :  { %v2746_v36 = vpop.f32.mrf.mxu1 }
 0x3d7   :  { %v675_v37 = vpop.f32.mrf.mxu1 }
 0x3d8   :  { %v720_v38 = vpack.c.bf16 %v675_v37, %v672_v35 }
 0x3d9   :  { %v2747_v28 = vpop.f32.mrf.mxu1 }
 0x3da   :  { %736 = vrot.lane.b32.xlu0 %v720_v38, %s2930_s12 }
 0x3db   :  { %v713_v39 = vpop.f32.mrf.mxu1 }
 0x3dd   :  { %v2752_v40 = vpop.f32.mrf.mxu1 }
 0x3de   :  { %884 = vrot.lane.b32.xlu0 %v3008_v3, %s2931_s13 }
 0x3df   :  { %v716_v42 = vpop.f32.mrf.mxu1 }
 0x3e0   :  { %v721_v43 = vpack.c.bf16 %v716_v42, %v713_v39  ;;  %v902_v42 = vsub.f32 1.0, %v3159_v55 }
 0x3e1   :  { %v2753_v44 = vpop.f32.mrf.mxu1 }
 0x3e2   :  { %738 = vrot.lane.b32.xlu1 %v721_v43, %s2930_s12 }
 0x3e6   :  { %886 = vrot.lane.b32.xlu1 %v3017_v5, %s2931_s13 }
 0x43c   :  { %v731_v47 = vpop.permute.xlu0 %730 }
 0x43d   :  { %v748_v50 = vsel %vm746_vm9, %v744_v49, %v731_v47 }
 0x43e   :  { %v751_v3 = vsel %vm399_vm7, %v748_v50, %v3139_v23 }
 0x444   :  { %v733_v54 = vpop.permute.xlu1 %732 }
 0x445   :  { %v750_v58 = vsel %vm746_vm9, %v745_v21, %v733_v54  ;;  %v2933_v54 = vmov 0   ;;  %v2852_v21 = vld [vmem:[%s3895_s7 + $0x38] sm:$0xff]  }
 0x446   :  { %v752_v20 = vsel %vm399_vm7, %v750_v58, %v3149_v32  ;;  %v2853_v58 = vld [vmem:[%s3895_s7 + $0x30] sm:$0xff]  }
 0x44c   :  { %v737_v52 = vpop.permute.xlu0 %736 }
 0x44d   :  { %v755_v5 = vsel %vm753_vm10, %v751_v3, %v737_v52 }
 0x44e   :  { %2768 = vmatprep.mubr.msk.bf16.mxu0 %vm466_vm8, %v755_v5 }
 0x450   :  { %v885_v18 = vpop.permute.xlu0 %884 }
 0x451   :  { %v896_v35 = vmul.f32 %v3161_v56, %v885_v18  ;;  %v903_v56 = vsub.f32 1.0, %v3163_v57 }
 0x454   :  { %v739_v59 = vpop.permute.xlu1 %738 }
 0x455   :  { %v757_v61 = vsel %vm753_vm10, %v752_v20, %v739_v59  ;;  %v2854_v20 = vld [vmem:[%s3895_s7 + $0x28] sm:$0xff]   ;;  %v2855_v59 = vld [vmem:[%s3895_s7 + $0x20] sm:$0xff]  }
 0x456   :  { %2769 = vmatmul.mubr.msk.bf16.vlgmr.msra.gmra.mxu0 %vm466_vm8, %v757_v61  ;;  %v2856_v61 = vld [vmem:[%s3895_s7 + $0x18] sm:$0xff]  }
 0x457   :  { %2792 = vmatprep.mubr.msk.bf16.mxu0 %vm2925_vm0, %v2924_v0 }
 0x458   :  { %v887_v19 = vpop.permute.xlu1 %886 }
 0x459   :  { %v897_v36 = vmul.f32 %v3169_v60, %v887_v19 }
 0x516   :  { %v2770_v23 = vpop.f32.mrf.mxu0 }
 0x517   :  { %v870_v6 = vadd.f32 %v2770_v23, %v2563_v26  ;;  %v2857_v23 = vld [vmem:[%s3895_s7 + $0x10] sm:$0xff]  }
 0x518   :  { %v861_v62 = vpop.f32.mrf.mxu0 }
 0x519   :  { %v862_v63 = vadd.f32 %v2563_v26, %v861_v62  ;;  %v2859_v62 = vld [vmem:[%s3895_s7] sm:$0xff]  }
 0x51a   :  { %v2771_v1 = vpop.f32.mrf.mxu0 }
 0x51b   :  { %2892 = vtanh.f32 %v862_v63  ;;  %v873_v32 = vadd.f32 %v2771_v1, %v2563_v26  ;;  %v2860_v63 = vld [vmem:[%s3895_s7 + $0x58] sm:$0xff]   ;;  %v2861_v1 = vld [vmem:[%s3895_s7 + $0x50] sm:$0xff]  }
 0x51c   :  { %v864_v27 = vpop.f32.mrf.mxu0 }
 0x51d   :  { %v865_v2 = vadd.f32 %v2563_v26, %v864_v27  ;;  %v2858_v26 = vld [vmem:[%s3895_s7 + $0x8] sm:$0xff]  }
 0x51e   :  { %v2862_v27 = vld [vmem:[%s3895_s7 + $0x48] sm:$0xff]  }
 0x51f   :  { %2894 = vtanh.f32 %v865_v2  ;;  %v2863_v2 = vld [vmem:[%s3895_s7 + $0x40] sm:$0xff]  }
 0x520   :  { %2896 = vtanh.f32 %v870_v6 }
 0x521   :  { %2898 = vtanh.f32 %v873_v32 }
 0x528   :  { %v2893_v7 = vpop.eup %2892 }
 0x529   :  { %908 = vrot.lane.b32.xlu0 %v2893_v7, %s2931_s13 }
 0x52c   :  { %v2895_v10 = vpop.eup %2894 }
 0x52d   :  { %910 = vrot.lane.b32.xlu1 %v2895_v10, %s2931_s13  ;;  %888 = vrot.lane.b32.xlu0 %v3022_v8, %s2931_s13  ;;  %v2897_v11 = vpop.eup %2896  ;;  %v1335_v8 = vpack.c.bf16 %v3259_v13, %v3254_v12 }
 0x52e   :  { %v2899_v15 = vpop.eup %2898 }
 0x531   :  { %890 = vrot.lane.b32.xlu1 %v3027_v9, %s2931_s13  ;;  %912 = vrot.lane.b32.xlu0 %v2897_v11, %s2931_s13  ;;  %v3267_v9 = vld [vmem:[%s3889_s1 + $0x30] sm:$0xff]  ;;  %s2932_s1 = smov 96  }
 0x532   :  { %v1336_v17 = vpack.c.bf16 %v3272_v16, %v3267_v9 }
 0x535   :  { %914 = vrot.lane.b32.xlu1 %v2899_v15, %s2931_s13 }
 0x539   :  { %1345 = vrot.lane.b32.xlu1 %v1335_v8, %s2931_s13 }
 0x53d   :  { %1347 = vrot.lane.b32.xlu1 %v1336_v17, %s2931_s13 }
 0x59b   :  { %v909_v22 = vpop.permute.xlu0 %908 }
 0x59c   :  { %v920_v31 = vmul.f32 %v909_v22, %v900_v24 }
 0x59e   :  { %v3282_v38 = vadd.f32 %v920_v31, %v896_v35 }
 0x59f   :  { %v911_v25 = vpop.permute.xlu1 %910  ;;  %v889_v34 = vpop.permute.xlu0 %888 }
 0x5a0   :  { %v921_v37 = vmul.f32 %v911_v25, %v901_v33  ;;  %v898_v60 = vmul.f32 %v3159_v55, %v889_v34 }
 0x5a2   :  { %v3284_v28 = vadd.f32 %v921_v37, %v897_v36 }
 0x5a3   :  { %v891_v39 = vpop.permute.xlu1 %890  ;;  %v913_v40 = vpop.permute.xlu0 %912 }
 0x5a4   :  { %v1328_v43 = vpack.c.bf16 %v3284_v28, %v3282_v38  ;;  %v922_v44 = vmul.f32 %v913_v40, %v902_v42  ;;  %v899_v46 = vmul.f32 %v3163_v57, %v891_v39 }
 0x5a6   :  { %1339 = vrot.lane.b32.xlu0 %v1328_v43, %s2932_s1  ;;  %v3293_v49 = vadd.f32 %v922_v44, %v898_v60 }
 0x5a7   :  { %v915_v45 = vpop.permute.xlu1 %914 }
 0x5a8   :  { %v923_v47 = vmul.f32 %v915_v45, %v903_v56  ;;  %v2582_v56 = vld [vmem:[%s3896_s8] ss:$0 sm:$0xff] }
 0x5aa   :  { %v3295_v50 = vadd.f32 %v923_v47, %v899_v46 }
 0x5ab   :  { %v1346_v3 = vpop.permute.xlu1 %1345 }
 0x5ac   :  { %v1329_v51 = vpack.c.bf16 %v3295_v50, %v3293_v49 }
 0x5ae   :  { %1341 = vrot.lane.b32.xlu0 %v1329_v51, %s2932_s1 }
 0x5af   :  { %v1348_v55 = vpop.permute.xlu1 %1347 }
 0x618   :  { %v3300_v52 = vpop.permute.xlu0 %1339 }
 0x619   :  { %v3304_v53 = vsel %vm1236_vm11, %v3300_v52, %v1346_v3 }
 0x61a   :  { %2773 = vmatpush3.bf16.msra.mxu1 %v3304_v53 }
 0x61b   :  { %2778 = vmatprep.subr.bf16.mxu1 %v2924_v0 }
 0x61d   :  { %2775 = vmatmul.mubr.msk.bf16.vlgmr.msra.gmra.mxu1 %vm69_vm1, %v3012_v4 }
 0x61e   :  { %2780 = vmatprep.mubr.msk.bf16.mxu1 %vm2925_vm0, %v2924_v0 }
 0x620   :  { %v3312_v57 = vpop.permute.xlu0 %1341 }
 0x621   :  { %v3316_v5 = vsel %vm1236_vm11, %v3312_v57, %v1348_v55 }
 0x622   :  { %2779 = vmatpush3.bf16.msra.mxu1 %v3316_v5  ;;  %2791 = vmatpush3.bf16.msra.mxu0 %v3316_v5 }
 0x623   :  { %2784 = vmatprep.subr.bf16.mxu1 %v2924_v0  ;;  %2796 = vmatprep.subr.bf16.mxu0 %v2924_v0 }
 0x625   :  { %2781 = vmatmul.mubr.msk.bf16.vlgmr.msra.gmra.mxu1 %vm69_vm1, %v3041_v14  ;;  %2793 = vmatmul.mubr.msk.bf16.vlgmr.msra.gmra.mxu0 %vm69_vm1, %v3106_v48 }
 0x626   :  { %2785 = vmatpush3.bf16.msra.mxu1 %v3304_v53  ;;  %2786 = vmatprep.mubr.msk.bf16.mxu1 %vm2925_vm0, %v2924_v0 }
 0x627   :  { %2798 = vmatprep.mubr.msk.bf16.mxu0 %vm2925_vm0, %v2924_v0  ;;  %1646 = vmatprep.subr.bf16.mxu1 %v2933_v54 }
 0x62d   :  { %2787 = vmatmul.mubr.msk.bf16.vlgmr.msra.gmra.mxu1 %vm69_vm1, %v3102_v41 }
 0x62e   :  { %1647 = vmatpush1.bf16.msra.mxu1 %v2852_v21 }
 0x62f   :  { %1648 = vmatprep.subr.bf16.mxu1 %v2933_v54 }
 0x632   :  { %1649 = vmatpush1.bf16.msra.mxu1 %v2853_v58 }
 0x633   :  { %1650 = vmatprep.subr.bf16.mxu1 %v2933_v54 }
 0x636   :  { %1651 = vmatpush1.bf16.msra.mxu1 %v2854_v20 }
 0x637   :  { %1652 = vmatprep.subr.bf16.mxu1 %v2933_v54 }
 0x63a   :  { %1653 = vmatpush1.bf16.msra.mxu1 %v2855_v59 }
 0x63b   :  { %1654 = vmatprep.subr.bf16.mxu1 %v2933_v54 }
 0x63e   :  { %1655 = vmatpush1.bf16.msra.mxu1 %v2856_v61 }
 0x63f   :  { %1656 = vmatprep.subr.bf16.mxu1 %v2933_v54 }
 0x642   :  { %1657 = vmatpush1.bf16.msra.mxu1 %v2857_v23 }
 0x643   :  { %1658 = vmatprep.subr.bf16.mxu1 %v2933_v54 }
 0x646   :  { %1659 = vmatpush1.bf16.msra.mxu1 %v2858_v26 }
 0x647   :  { %1660 = vmatprep.subr.bf16.mxu1 %v2933_v54 }
 0x64a   :  { %1661 = vmatpush1.bf16.msra.mxu1 %v2859_v62 }
 0x64b   :  { %1670 = vmatprep.subr.bf16.mxu1 %v2933_v54 }
 0x64e   :  { %1671 = vmatpush2.bf16.msra.mxu1 %v2860_v63 }
 0x64f   :  { %1672 = vmatprep.subr.bf16.mxu1 %v2933_v54 }
 0x652   :  { %1673 = vmatpush2.bf16.msra.mxu1 %v2861_v1 }
 0x653   :  { %1674 = vmatprep.subr.bf16.mxu1 %v2933_v54 }
 0x656   :  { %1675 = vmatpush2.bf16.msra.mxu1 %v2862_v27 }
 0x657   :  { %1676 = vmatprep.subr.bf16.mxu1 %v2933_v54 }
 0x65a   :  { %1677 = vmatpush2.bf16.msra.mxu1 %v2863_v2 }
 0x6dd   :  { %v1391_v6 = vpop.f32.mrf.mxu1 }
 0x6df   :  { %v2776_v32 = vpop.f32.mrf.mxu1 }
 0x6e1   :  { %v1394_v7 = vpop.f32.mrf.mxu1 }
 0x6e2   :  { %v1439_v10 = vpack.c.bf16 %v1394_v7, %v1391_v6 }
 0x6e3   :  { %v2777_v11 = vpop.f32.mrf.mxu1 }
 0x6e4   :  { %1527 = vrot.lane.b32.xlu0 %v1439_v10, %s2934_s19 }
 0x6e5   :  { %v1432_v15 = vpop.f32.mrf.mxu1  ;;  %v1516_v8 = vpop.f32.mrf.mxu0 }
 0x6e7   :  { %v2782_v17 = vpop.f32.mrf.mxu1  ;;  %v2794_v18 = vpop.f32.mrf.mxu0 }
 0x6e9   :  { %v1435_v19 = vpop.f32.mrf.mxu1  ;;  %v1519_v22 = vpop.f32.mrf.mxu0 }
 0x6ea   :  { %v1440_v24 = vpack.c.bf16 %v1435_v19, %v1432_v15  ;;  %v3382_v31 = vpack.c.bf16 %v1519_v22, %v1516_v8 }
 0x6eb   :  { %v2783_v33 = vpop.f32.mrf.mxu1  ;;  %v2795_v25 = vpop.f32.mrf.mxu0 }
 0x6ec   :  { %1529 = vrot.lane.b32.xlu1 %v1440_v24, %s2934_s19  ;;  %v2868_v25 = vld [vmem:[%s3897_s9 + $0x18] sm:$0xff]  }
 0x6ed   :  { %v1475_v34 = vpop.f32.mrf.mxu1 }
 0x6ef   :  { %v2788_v35 = vpop.f32.mrf.mxu1 }
 0x6f0   :  { %v2870_v35 = vld [vmem:[%s3897_s9 + $0x8] sm:$0xff]  }
 0x6f1   :  { %v1478_v36 = vpop.f32.mrf.mxu1 }
 0x6f2   :  { %v3385_v37 = vpack.c.bf16 %v1478_v36, %v1475_v34  ;;  %v2869_v34 = vld [vmem:[%s3897_s9 + $0x10] sm:$0xff]   ;;  %v2871_v36 = vld [vmem:[%s3897_s9] sm:$0xff]  }
 0x6f3   :  { %v2789_v39 = vpop.f32.mrf.mxu1 }
 0x6f4   :  { %2595 = vmatprep.mubr.msk.bf16.mxu1 %vm1239_vm12, %v3385_v37  ;;  %v2872_v39 = vld [vmem:[%s3897_s9 + $0x58] sm:$0xff]  }
 0x756   :  { %v3389_v40 = vpop.permute.xlu0 %1527 }
 0x757   :  { %v1532_v42 = vsel %vm1239_vm12, %v3304_v53, %v3389_v40 }
 0x758   :  { %1679 = vmatmul.mubr.bf16.vlgmr.msra.gmra.mxu1 %v1532_v42  ;;  %v2873_v42 = vld [vmem:[%s3897_s9 + $0x50] sm:$0xff]  }
 0x759   :  { %2596 = vmatprep.mubr.msk.bf16.mxu1 %vm1239_vm12, %v3382_v31 }
 0x75e   :  { %v3396_v43 = vpop.permute.xlu1 %1529 }
 0x75f   :  { %v1535_v44 = vsel %vm1239_vm12, %v3316_v5, %v3396_v43 }
 0x760   :  { %1687 = vmatmul.mubr.bf16.gmra.mxu1 %v1535_v44 }
 0x818   :  { %v1680_v45 = vpop.f32.mrf.mxu1 }
 0x819   :  { %v1681_v60 = vadd.f32 %v2582_v56, %v1680_v45 }
 0x81a   :  { %v1682_v46 = vpop.f32.mrf.mxu1 }
 0x81b   :  { %v2597_v47 = vmul.f32 -1.442695, %v1681_v60  ;;  %v2875_v46 = vld [vmem:[%s3897_s9 + $0x40] sm:$0xff]  }
 0x81c   :  { %v1683_v51 = vpop.f32.mrf.mxu1 }
 0x81d   :  { %2900 = vpow2.f32 %v2597_v47  ;;  %v1684_v3 = vadd.f32 %v2582_v56, %v1683_v51 }
 0x81e   :  { %v1685_v53 = vpop.f32.mrf.mxu1 }
 0x81f   :  { %v2598_v55 = vmul.f32 -1.442695, %v1684_v3 }
 0x820   :  { %v1688_v21 = vpop.f32.mrf.mxu1 }
 0x821   :  { %2902 = vpow2.f32 %v2598_v55  ;;  %v1689_v58 = vadd.f32 %v2582_v56, %v1688_v21 }
 0x822   :  { %v1690_v20 = vpop.f32.mrf.mxu1 }
 0x823   :  { %v2599_v59 = vmul.f32 -1.442695, %v1689_v58 }
 0x824   :  { %v1691_v5 = vpop.f32.mrf.mxu1 }
 0x825   :  { %2904 = vpow2.f32 %v2599_v59  ;;  %v1692_v61 = vadd.f32 %v2582_v56, %v1691_v5  ;;  %v2874_v56 = vld [vmem:[%s3897_s9 + $0x48] sm:$0xff]  }
 0x826   :  { %v1693_v23 = vpop.f32.mrf.mxu1 }
 0x827   :  { %v2600_v26 = vmul.f32 -1.442695, %v1692_v61 }
 0x829   :  { %2906 = vpow2.f32 %v2600_v26 }
 0x82a   :  { %v2901_v62 = vpop.eup %2900 }
 0x82b   :  { %v1707_v63 = vadd.f32 1.0, %v2901_v62 }
 0x82d   :  { %2908 = vrcp.f32 %v1707_v63 }
 0x82e   :  { %v2903_v1 = vpop.eup %2902 }
 0x82f   :  { %v1708_v27 = vadd.f32 1.0, %v2903_v1 }
 0x831   :  { %2910 = vrcp.f32 %v1708_v27 }
 0x832   :  { %v2905_v2 = vpop.eup %2904 }
 0x833   :  { %v1709_v6 = vadd.f32 1.0, %v2905_v2 }
 0x835   :  { %2912 = vrcp.f32 %v1709_v6 }
 0x836   :  { %v2907_v32 = vpop.eup %2906 }
 0x837   :  { %v1710_v7 = vadd.f32 1.0, %v2907_v32 }
 0x839   :  { %2914 = vrcp.f32 %v1710_v7 }
 0x83a   :  { %v3404_v10 = vpop.eup %2908 }
 0x83b   :  { %v1719_v15 = vmul.f32 %v3404_v10, %v3254_v12 }
 0x83e   :  { %v3406_v11 = vpop.eup %2910 }
 0x83f   :  { %v1720_v8 = vmul.f32 %v3406_v11, %v3259_v13 }
 0x841   :  { %v1723_v17 = vpack.c.bf16 %v1720_v8, %v1719_v15 }
 0x842   :  { %v3413_v18 = vpop.eup %2912 }
 0x843   :  { %1895 = vrot.lane.b32.xlu0 %v1723_v17, %s2931_s13  ;;  %2797 = vmatpush3.bf16.msra.mxu0 %v1723_v17  ;;  %v1721_v22 = vmul.f32 %v3413_v18, %v3267_v9 }
 0x844   :  { %2802 = vmatprep.subr.bf16.mxu0 %v2924_v0 }
 0x846   :  { %v3416_v19 = vpop.eup %2914  ;;  %2799 = vmatmul.mubr.msk.bf16.vlgmr.msra.gmra.mxu0 %vm69_vm1, %v3012_v4  ;;  %v2864_v4 = vld [vmem:[%s3897_s9 + $0x38] sm:$0xff]  }
 0x847   :  { %v1722_v24 = vmul.f32 %v3416_v19, %v3272_v16  ;;  %2804 = vmatprep.mubr.msk.bf16.mxu0 %vm2925_vm0, %v2924_v0 }
 0x849   :  { %v3426_v33 = vpack.c.bf16 %v1722_v24, %v1721_v22 }
 0x84b   :  { %2803 = vmatpush3.bf16.msra.mxu0 %v3426_v33 }
 0x84c   :  { %2808 = vmatprep.subr.bf16.mxu0 %v2924_v0 }
 0x84e   :  { %2805 = vmatmul.mubr.msk.bf16.vlgmr.msra.gmra.mxu0 %vm69_vm1, %v3041_v14  ;;  %v2865_v14 = vld [vmem:[%s3897_s9 + $0x30] sm:$0xff]  }
 0x84f   :  { %2809 = vmatpush3.bf16.msra.mxu0 %v1723_v17  ;;  %2810 = vmatprep.mubr.msk.bf16.mxu0 %vm2925_vm0, %v2924_v0 }
 0x850   :  { %2814 = vmatprep.subr.bf16.mxu0 %v2924_v0 }
 0x856   :  { %2811 = vmatmul.mubr.msk.bf16.vlgmr.msra.gmra.mxu0 %vm69_vm1, %v3102_v41  ;;  %v2866_v41 = vld [vmem:[%s3897_s9 + $0x28] sm:$0xff]  }
 0x857   :  { %2815 = vmatpush3.bf16.msra.mxu0 %v3426_v33  ;;  %2816 = vmatprep.mubr.msk.bf16.mxu0 %vm2925_vm0, %v2924_v0 }
 0x858   :  { %2034 = vmatprep.subr.bf16.mxu0 %v2933_v54 }
 0x85e   :  { %2817 = vmatmul.mubr.msk.bf16.vlgmr.msra.gmra.mxu0 %vm69_vm1, %v3106_v48  ;;  %v2867_v48 = vld [vmem:[%s3897_s9 + $0x20] sm:$0xff]  }
 0x85f   :  { %2035 = vmatpush1.bf16.msra.mxu0 %v2864_v4 }
 0x860   :  { %2036 = vmatprep.subr.bf16.mxu0 %v2933_v54 }
 0x863   :  { %2037 = vmatpush1.bf16.msra.mxu0 %v2865_v14 }
 0x864   :  { %2038 = vmatprep.subr.bf16.mxu0 %v2933_v54 }
 0x867   :  { %2039 = vmatpush1.bf16.msra.mxu0 %v2866_v41 }
 0x868   :  { %2040 = vmatprep.subr.bf16.mxu0 %v2933_v54 }
 0x86b   :  { %2041 = vmatpush1.bf16.msra.mxu0 %v2867_v48 }
 0x86c   :  { %2042 = vmatprep.subr.bf16.mxu0 %v2933_v54 }
 0x86f   :  { %2043 = vmatpush1.bf16.msra.mxu0 %v2868_v25 }
 0x870   :  { %2044 = vmatprep.subr.bf16.mxu0 %v2933_v54 }
 0x873   :  { %2045 = vmatpush1.bf16.msra.mxu0 %v2869_v34 }
 0x874   :  { %2046 = vmatprep.subr.bf16.mxu0 %v2933_v54 }
 0x877   :  { %2047 = vmatpush1.bf16.msra.mxu0 %v2870_v35 }
 0x878   :  { %2048 = vmatprep.subr.bf16.mxu0 %v2933_v54 }
 0x87b   :  { %2049 = vmatpush1.bf16.msra.mxu0 %v2871_v36 }
 0x87c   :  { %2058 = vmatprep.subr.bf16.mxu0 %v2933_v54 }
 0x87f   :  { %2059 = vmatpush2.bf16.msra.mxu0 %v2872_v39 }
 0x880   :  { %2060 = vmatprep.subr.bf16.mxu0 %v2933_v54 }
 0x883   :  { %2061 = vmatpush2.bf16.msra.mxu0 %v2873_v42 }
 0x884   :  { %2062 = vmatprep.subr.bf16.mxu0 %v2933_v54 }
 0x887   :  { %2063 = vmatpush2.bf16.msra.mxu0 %v2874_v56 }
 0x888   :  { %2064 = vmatprep.subr.bf16.mxu0 %v2933_v54 }
 0x88b   :  { %2065 = vmatpush2.bf16.msra.mxu0 %v2875_v46  ;;  %v2936_v46 = vmov 1934713408  }
 0x8b5   :  { %v1896_v27 = vpop.permute.xlu0 %1895 }
 0x8b6   :  { %v1912_v2 = vsel %vm1236_vm11, %v3300_v52, %v1896_v27 }
 0x8b7   :  { %v1915_v7 = vsel %vm1239_vm12, %v1912_v2, %v3389_v40 }
 0x906   :  { %v1759_v44 = vpop.f32.mrf.mxu0 }
 0x908   :  { %v2800_v45 = vpop.f32.mrf.mxu0 }
 0x909   :  { %v2935_v45 = vmov 1983009808  }
 0x90a   :  { %v1762_v60 = vpop.f32.mrf.mxu0 }
 0x90b   :  { %v1807_v47 = vpack.c.bf16 %v1762_v60, %v1759_v44  ;;  %v946_v60 = vunpack.c.l.s4 %v2935_v45 }
 0x90c   :  { %v2801_v51 = vpop.f32.mrf.mxu0 }
 0x90d   :  { %1901 = vrot.lane.b32.xlu0 %v1807_v47, %s2932_s1  ;;  %v961_v47 = vunpack.c.l.s4 %v2936_v46 }
 0x90e   :  { %v1800_v3 = vpop.f32.mrf.mxu0 }
 0x910   :  { %v2806_v53 = vpop.f32.mrf.mxu0 }
 0x912   :  { %v1803_v55 = vpop.f32.mrf.mxu0 }
 0x913   :  { %v1808_v62 = vpack.c.bf16 %v1803_v55, %v1800_v3  ;;  %v947_v3 = vunpack.c.0.s8 %v946_v60 }
 0x914   :  { %v2807_v21 = vpop.f32.mrf.mxu0 }
 0x916   :  { %v1843_v58 = vpop.f32.mrf.mxu0 }
 0x918   :  { %v2812_v20 = vpop.f32.mrf.mxu0 }
 0x91a   :  { %v1846_v59 = vpop.f32.mrf.mxu0 }
 0x91b   :  { %v1891_v5 = vpack.c.bf16 %v1846_v59, %v1843_v58 }
 0x91c   :  { %v2813_v61 = vpop.f32.mrf.mxu0 }
 0x91d   :  { %1907 = vrot.lane.b32.xlu1 %v1891_v5, %s2931_s13 }
 0x91e   :  { %v1884_v23 = vpop.f32.mrf.mxu0 }
 0x920   :  { %v2818_v26 = vpop.f32.mrf.mxu0 }
 0x921   :  { %1897 = vrot.lane.b32.xlu1 %v3426_v33, %s2931_s13 }
 0x922   :  { %v1887_v54 = vpop.f32.mrf.mxu0 }
 0x923   :  { %v1892_v63 = vpack.c.bf16 %v1887_v54, %v1884_v23 }
 0x924   :  { %v2819_v1 = vpop.f32.mrf.mxu0 }
 0x925   :  { %1903 = vrot.lane.b32.xlu1 %v1808_v62, %s2932_s1  ;;  %1909 = vrot.lane.b32.xlu0 %v1892_v63, %s2931_s13 }
 0x929   :  { %2093 = vrot.lane.b32.xlu1 %v3259_v13, %s2931_s13  ;;  %2091 = vrot.lane.b32.xlu0 %v3254_v12, %s2931_s13 }
 0x92d   :  { %2097 = vrot.lane.b32.xlu1 %v3272_v16, %s2931_s13  ;;  %2095 = vrot.lane.b32.xlu0 %v3267_v9, %s2931_s13 }
 0x97f   :  { %v1902_v6 = vpop.permute.xlu0 %1901 }
 0x980   :  { %v1918_v12 = vsel %vm1242_vm13, %v1915_v7, %v1902_v6 }
 0x98f   :  { %v1908_v32 = vpop.permute.xlu1 %1907 }
 0x990   :  { %v1924_v13 = vsel %vm1236_vm11, %v3385_v37, %v1908_v32  ;;  %v2605_v37 = vld [vmem:[%s3898_s10] ss:$0 sm:$0xff] }
 0x991   :  { %2618 = vmatprep.mubr.msk.bf16.mxu0 %vm1239_vm12, %v1924_v13 }
 0x992   :  { %2067 = vmatmul.mubr.bf16.vlgmr.msra.gmra.mxu0 %v1918_v12 }
 0x993   :  { %v1898_v16 = vpop.permute.xlu1 %1897 }
 0x994   :  { %v1914_v9 = vsel %vm1236_vm11, %v3312_v57, %v1898_v16 }
 0x995   :  { %v1916_v8 = vsel %vm1239_vm12, %v1914_v9, %v3396_v43 }
 0x997   :  { %v1904_v15 = vpop.permute.xlu1 %1903  ;;  %v1910_v52 = vpop.permute.xlu0 %1909 }
 0x998   :  { %v1926_v40 = vsel %vm1236_vm11, %v3382_v31, %v1910_v52  ;;  %v1921_v17 = vsel %vm1242_vm13, %v1916_v8, %v1904_v15 }
 0x999   :  { %2619 = vmatprep.mubr.msk.bf16.mxu0 %vm1239_vm12, %v1926_v40 }
 0x99a   :  { %2075 = vmatmul.mubr.bf16.gmra.mxu0 %v1921_v17 }
 0x99b   :  { %v3535_v44 = vpop.permute.xlu0 %2091 }
 0x99f   :  { %v3537_v56 = vpop.permute.xlu0 %2095 }
 0xa52   :  { %v2068_v22 = vpop.f32.mrf.mxu0 }
 0xa53   :  { %v2069_v24 = vadd.f32 %v2605_v37, %v2068_v22 }
 0xa54   :  { %v2070_v57 = vpop.f32.mrf.mxu0 }
 0xa55   :  { %2916 = vtanh.f32 %v2069_v24 }
 0xa56   :  { %v2071_v33 = vpop.f32.mrf.mxu0 }
 0xa57   :  { %v2072_v4 = vadd.f32 %v2605_v37, %v2071_v33 }
 0xa58   :  { %v2073_v14 = vpop.f32.mrf.mxu0 }
 0xa59   :  { %2918 = vtanh.f32 %v2072_v4 }
 0xa5a   :  { %v2076_v43 = vpop.f32.mrf.mxu0 }
 0xa5b   :  { %v2077_v41 = vadd.f32 %v2605_v37, %v2076_v43 }
 0xa5c   :  { %v2078_v31 = vpop.f32.mrf.mxu0 }
 0xa5d   :  { %2920 = vtanh.f32 %v2077_v41  ;;  %v2107_v41 = vsub.f32 1.0, %v3404_v10 }
 0xa5e   :  { %v2079_v48 = vpop.f32.mrf.mxu0 }
 0xa5f   :  { %v2080_v25 = vadd.f32 %v2605_v37, %v2079_v48 }
 0xa60   :  { %v2081_v34 = vpop.f32.mrf.mxu0 }
 0xa61   :  { %2922 = vtanh.f32 %v2080_v25 }
 0xa62   :  { %v2917_v35 = vpop.eup %2916 }
 0xa63   :  { %2115 = vrot.lane.b32.xlu0 %v2917_v35, %s2931_s13 }
 0xa66   :  { %v2919_v36 = vpop.eup %2918 }
 0xa67   :  { %2117 = vrot.lane.b32.xlu1 %v2919_v36, %s2931_s13  ;;  %v2103_v36 = vmul.f32 %v3404_v10, %v3535_v44  ;;  %v2105_v44 = vmul.f32 %v3413_v18, %v3537_v56 }
 0xa6a   :  { %v2921_v39 = vpop.eup %2920 }
 0xa6b   :  { %2119 = vrot.lane.b32.xlu0 %v2921_v39, %s2931_s13  ;;  %v2108_v39 = vsub.f32 1.0, %v3406_v11 }
 0xa6e   :  { %v2923_v42 = vpop.eup %2922 }
 0xa6f   :  { %2121 = vrot.lane.b32.xlu1 %v2923_v42, %s2931_s13  ;;  %932 = vrot.lane.b32.xlu0 %v3282_v38, %s2932_s1  ;;  %v962_v38 = vunpack.c.0.s8 %v961_v47  ;;  %v2109_v42 = vsub.f32 1.0, %v3413_v18 }
 0xa73   :  { %934 = vrot.lane.b32.xlu1 %v3284_v28, %s2932_s1  ;;  %936 = vrot.lane.b32.xlu0 %v3293_v49, %s2932_s1  ;;  %v3542_v28 = vsub.s32 %v947_v3, %v3095_v30  ;;  %v3544_v49 = vpop.permute.xlu1 %2093 }
 0xa74   :  { %v2104_v10 = vmul.f32 %v3406_v11, %v3544_v49 }
 0xa77   :  { %938 = vrot.lane.b32.xlu1 %v3295_v50, %s2932_s1  ;;  %v3547_v50 = vsub.s32 %v962_v38, %v3095_v30  ;;  %v3550_v58 = vpop.permute.xlu1 %2097  ;;  %v2110_v38 = vsub.f32 1.0, %v3416_v19 }
 0xa78   :  { %v2106_v11 = vmul.f32 %v3416_v19, %v3550_v58 }
 0xad5   :  { %v2116_v51 = vpop.permute.xlu0 %2115 }
 0xad6   :  { %v2127_v31 = vmul.f32 %v2116_v51, %v2107_v41 }
 0xad8   :  { %v2131_v45 = vadd.f32 %v2127_v31, %v2103_v36 }
 0xad9   :  { %v2118_v54 = vpop.permute.xlu1 %2117 }
 0xada   :  { %v2128_v60 = vmul.f32 %v2118_v54, %v2108_v39 }
 0xadd   :  { %v3539_v53 = vpop.permute.xlu0 %2119 }
 0xade   :  { %v2129_v46 = vmul.f32 %v3539_v53, %v2109_v42  ;;  %v2132_v53 = vadd.f32 %v2128_v60, %v2104_v10 }
 0xae1   :  { %v933_v55 = vpop.permute.xlu0 %932  ;;  %v2122_v32 = vpop.permute.xlu1 %2121 }
 0xae2   :  { %v951_v21 = vrot.slane %v933_v55, %v3542_v28  ;;  %v944_v5 = vcombine.high %v933_v55, %v2924_v0  ;;  %v2133_v55 = vadd.f32 %v2129_v46, %v2105_v44 }
 0xae4   :  { %v3553_v20 = vrot.slane %v951_v21, %v3547_v50  ;;  %v959_v61 = vcombine.high %v951_v21, %v2924_v0  ;;  %v958_v63 = vrot.slane %v944_v5, %v3542_v28  ;;  %v2130_v21 = vmul.f32 %v2122_v32, %v2110_v38 }
 0xae5   :  { %v937_v59 = vpop.permute.xlu0 %936  ;;  %v935_v9 = vpop.permute.xlu1 %934 }
 0xae6   :  { %v1049_v23 = vrot.slane %v937_v59, %v3542_v28  ;;  %v989_v26 = vcombine.high %v3553_v20, %v2924_v0  ;;  %v1042_v1 = vcombine.high %v937_v59, %v2924_v0  ;;  %v973_v2 = vrot.slane %v959_v61, %v3547_v50 }
 0xae7   :  { %v3573_v7 = vrot.slane %v958_v63, %v3547_v50  ;;  %v974_v15 = vcombine.high %v958_v63, %v2924_v0  ;;  %v1000_v17 = vrot.slane %v935_v9, %v3542_v28  ;;  %v993_v48 = vcombine.high %v935_v9, %v2924_v0 }
 0xae8   :  { %v3561_v62 = vrot.slane %v1049_v23, %v3547_v50  ;;  %1142 = vrot.lane.b32.xlu0 %v989_v26, %s2931_s13  ;;  %v1057_v27 = vcombine.high %v1049_v23, %v2924_v0  ;;  %v1056_v13 = vrot.slane %v1042_v1, %v3542_v28  ;;  %v990_v12 = vcombine.high %v973_v2, %v2924_v0 }
 0xae9   :  { %v991_v8 = vcombine.high %v3573_v7, %v2924_v0  ;;  %v988_v22 = vrot.slane %v974_v15, %v3547_v50  ;;  %v939_v57 = vpop.permute.xlu1 %938  ;;  %v3597_v33 = vrot.slane %v1000_v17, %v3547_v50  ;;  %v1007_v47 = vrot.slane %v993_v48, %v3542_v28 }
 0xaea   :  { %v1087_v6 = vcombine.high %v3561_v62, %v2924_v0  ;;  %v1071_v16 = vrot.slane %v1057_v27, %v3547_v50  ;;  %v3582_v52 = vrot.slane %v1056_v13, %v3547_v50  ;;  %v1072_v37 = vcombine.high %v1056_v13, %v2924_v0 }
 0xaeb   :  { %v1098_v4 = vrot.slane %v939_v57, %v3542_v28  ;;  %v992_v14 = vcombine.high %v988_v22, %v2924_v0  ;;  %v1038_v34 = vcombine.high %v3597_v33, %v2924_v0  ;;  %v1091_v51 = vcombine.high %v939_v57, %v2924_v0 }
 0xaec   :  { %1150 = vrot.lane.b32.xlu0 %v973_v2, %s2934_s19  ;;  %1144 = vrot.lane.b32.xlu1 %v1087_v6, %s2931_s13  ;;  %v1088_v40 = vcombine.high %v1071_v16, %v2924_v0  ;;  %v1089_v24 = vcombine.high %v3582_v52, %v2924_v0  ;;  %v1086_v43 = vrot.slane %v1072_v37, %v3547_v50 }
 0xaed   :  { %v3607_v25 = vrot.slane %v1098_v4, %v3547_v50  ;;  %v3631_v59 = vrot.slane %v1007_v47, %v3547_v50  ;;  %v1105_v5 = vrot.slane %v1091_v51, %v3542_v28  ;;  %v2134_v18 = vadd.f32 %v2130_v21, %v2106_v11 }
 0xaee   :  { %v1090_v35 = vcombine.high %v1086_v43, %v2924_v0  ;;  %v1008_v56 = vcombine.high %v1000_v17, %v2924_v0  ;;  %v1023_v23 = vcombine.high %v1007_v47, %v2924_v0  ;;  %v1106_v19 = vcombine.high %v1098_v4, %v2924_v0 }
 0xaef   :  { %v1136_v3 = vcombine.high %v3607_v25, %v2924_v0  ;;  %v3640_v49 = vrot.slane %v1105_v5, %v3547_v50  ;;  %v1040_v61 = vcombine.high %v3631_v59, %v2924_v0  ;;  %v1121_v54 = vcombine.high %v1105_v5, %v2924_v0 }
 0xaf0   :  { %1158 = vrot.lane.b32.xlu0 %v990_v12, %s2932_s1  ;;  %1152 = vrot.lane.b32.xlu1 %v1071_v16, %s2934_s19  ;;  %v1022_v58 = vrot.slane %v1008_v56, %v3547_v50  ;;  %v1037_v63 = vrot.slane %v1023_v23, %v3547_v50  ;;  %v1120_v1 = vrot.slane %v1106_v19, %v3547_v50  ;;  %v2937_v11 = vmov 1966171168  }
 0xaf1   :  { %v1138_v26 = vcombine.high %v3640_v49, %v2924_v0  ;;  %v1135_v2 = vrot.slane %v1121_v54, %v3547_v50 }
 0xaf2   :  { %v1039_v27 = vcombine.high %v1022_v58, %v2924_v0  ;;  %v1041_v6 = vcombine.high %v1037_v63, %v2924_v0  ;;  %v1137_v32 = vcombine.high %v1120_v1, %v2924_v0 }
 0xaf3   :  { %v1139_v13 = vcombine.high %v1135_v2, %v2924_v0 }
 0xaf4   :  { %1166 = vrot.lane.b32.xlu0 %v991_v8, %s2931_s13  ;;  %1160 = vrot.lane.b32.xlu1 %v1088_v40, %s2932_s1 }
 0xaf8   :  { %1174 = vrot.lane.b32.xlu0 %v988_v22, %s2934_s19  ;;  %1168 = vrot.lane.b32.xlu1 %v1089_v24, %s2931_s13 }
 0xafc   :  { %1182 = vrot.lane.b32.xlu0 %v992_v14, %s2932_s1  ;;  %1176 = vrot.lane.b32.xlu1 %v1086_v43, %s2934_s19 }
 0xb00   :  { %1190 = vrot.lane.b32.xlu0 %v1038_v34, %s2931_s13  ;;  %1184 = vrot.lane.b32.xlu1 %v1090_v35, %s2932_s1 }
 0xb04   :  { %2139 = vrot.lane.b32.xlu0 %v2131_v45, %s2932_s1  ;;  %1192 = vrot.lane.b32.xlu1 %v1136_v3, %s2931_s13 }
 0xb08   :  { %2143 = vrot.lane.b32.xlu0 %v2133_v55, %s2932_s1  ;;  %2141 = vrot.lane.b32.xlu1 %v2132_v53, %s2932_s1 }
 0xb0c   :  { %1214 = vrot.lane.b32.xlu0 %v1040_v61, %s2931_s13  ;;  %2145 = vrot.lane.b32.xlu1 %v2134_v18, %s2932_s1  ;;  %v1274_v18 = vunpack.c.l.s4 %v2937_v11 }
 0xb10   :  { %1198 = vrot.lane.b32.xlu0 %v1022_v58, %s2934_s19  ;;  %1216 = vrot.lane.b32.xlu1 %v1138_v26, %s2931_s13 }
 0xb14   :  { %1222 = vrot.lane.b32.xlu0 %v1037_v63, %s2934_s19  ;;  %1200 = vrot.lane.b32.xlu1 %v1120_v1, %s2934_s19  ;;  %v1275_v1 = vunpack.c.0.s8 %v1274_v18 }
 0xb18   :  { %1206 = vrot.lane.b32.xlu0 %v1039_v27, %s2932_s1  ;;  %1224 = vrot.lane.b32.xlu1 %v1135_v2, %s2934_s19 }
 0xb1c   :  { %1230 = vrot.lane.b32.xlu0 %v1041_v6, %s2932_s1  ;;  %1208 = vrot.lane.b32.xlu1 %v1137_v32, %s2932_s1 }
 0xb20   :  { %1232 = vrot.lane.b32.xlu1 %v1139_v13, %s2932_s1 }
 0xb5a   :  { %v1143_v12 = vpop.permute.xlu0 %1142 }
 0xb5b   :  { %v1237_v27 = vsel %vm1236_vm11, %v3553_v20, %v1143_v12 }
 0xb5e   :  { %v1145_v16 = vpop.permute.xlu1 %1144  ;;  %v1151_v9 = vpop.permute.xlu0 %1150 }
 0xb62   :  { %v1153_v15 = vpop.permute.xlu1 %1152  ;;  %v1159_v8 = vpop.permute.xlu0 %1158 }
 0xb66   :  { %v1161_v40 = vpop.permute.xlu1 %1160  ;;  %v1167_v17 = vpop.permute.xlu0 %1166 }
 0xb67   :  { %v1245_v58 = vsel %vm1236_vm11, %v3573_v7, %v1167_v17  ;;  %v1238_v17 = vsel %vm1236_vm11, %v3561_v62, %v1145_v16 }
 0xb6a   :  { %v1169_v37 = vpop.permute.xlu1 %1168  ;;  %v1175_v22 = vpop.permute.xlu0 %1174 }
 0xb6b   :  { %v1247_v26 = vsel %vm1239_vm12, %v1245_v58, %v1175_v22  ;;  %v1240_v22 = vsel %vm1239_vm12, %v1237_v27, %v1151_v9  ;;  %v1246_v62 = vsel %vm1236_vm11, %v3582_v52, %v1169_v37 }
 0xb6c   :  { %v1243_v20 = vsel %vm1242_vm13, %v1240_v22, %v1159_v8 }
 0xb6e   :  { %v3668_v24 = vpop.permute.xlu1 %1176  ;;  %v1183_v57 = vpop.permute.xlu0 %1182 }
 0xb6f   :  { %v1249_v2 = vsel %vm1242_vm13, %v1247_v26, %v1183_v57 }
 0xb70   :  { %v1271_v16 = vcombine.low %v1243_v20, %v1249_v2 }
 0xb72   :  { %v3670_v4 = vpop.permute.xlu1 %1184  ;;  %v3672_v14 = vpop.permute.xlu0 %1190 }
 0xb76   :  { %v3674_v43 = vpop.permute.xlu1 %1192  ;;  %v2140_v41 = vpop.permute.xlu0 %2139 }
 0xb77   :  { %v2151_v31 = vcombine.high %v2140_v41, %v2924_v0  ;;  %v2158_v48 = vrot.slane %v2140_v41, %v3542_v28  ;;  %v1241_v41 = vsel %vm1239_vm12, %v1238_v17, %v1153_v15 }
 0xb79   :  { %v3679_v34 = vrot.slane %v2158_v48, %v3547_v50  ;;  %v2165_v39 = vrot.slane %v2151_v31, %v3542_v28  ;;  %v2166_v42 = vcombine.high %v2158_v48, %v2924_v0  ;;  %v3734_v31 = vsub.s32 %v1275_v1, %v3095_v30 }
 0xb7a   :  { %v2142_v35 = vpop.permute.xlu1 %2141  ;;  %v2144_v36 = vpop.permute.xlu0 %2143  ;;  %v1244_v48 = vsel %vm1242_vm13, %v1241_v41, %v1161_v40  ;;  %v1248_v30 = vsel %vm1239_vm12, %v1246_v62, %v3668_v24  ;;  %v1251_v40 = vsel %vm1236_vm11, %v3597_v33, %v3672_v14 }
 0xb7b   :  { %v2249_v45 = vcombine.high %v2144_v36, %v2924_v0  ;;  %v2256_v60 = vrot.slane %v2144_v36, %v3542_v28  ;;  %v2196_v46 = vcombine.high %v3679_v34, %v2924_v0  ;;  %v3694_v10 = vrot.slane %v2165_v39, %v3547_v50 }
 0xb7c   :  { %v2180_v53 = vrot.slane %v2166_v42, %v3547_v50  ;;  %v2181_v56 = vcombine.high %v2165_v39, %v2924_v0  ;;  %v2207_v6 = vrot.slane %v2142_v35, %v3542_v28  ;;  %v2200_v52 = vcombine.high %v2142_v35, %v2924_v0 }
 0xb7d   :  { %v3688_v47 = vrot.slane %v2256_v60, %v3547_v50  ;;  %2349 = vrot.lane.b32.xlu0 %v2196_v46, %s2931_s13  ;;  %v2263_v44 = vrot.slane %v2249_v45, %v3542_v28  ;;  %v2264_v38 = vcombine.high %v2256_v60, %v2924_v0  ;;  %v2198_v23 = vcombine.high %v3694_v10, %v2924_v0 }
 0xb7e   :  { %v3691_v51 = vpop.permute.xlu1 %2145  ;;  %v1215_v3 = vpop.permute.xlu0 %1214  ;;  %v3721_v7 = vrot.slane %v2181_v56, %v3547_v50  ;;  %v3740_v9 = vrot.slane %v2207_v6, %v3547_v50  ;;  %v2197_v8 = vcombine.high %v2180_v53, %v2924_v0  ;;  %v1250_v39 = vsel %vm1242_vm13, %v1248_v30, %v3670_v4 }
 0xb7f   :  { %v2294_v55 = vcombine.high %v3688_v47, %v2924_v0  ;;  %v3705_v61 = vrot.slane %v2263_v44, %v3547_v50  ;;  %v2278_v19 = vrot.slane %v2264_v38, %v3547_v50  ;;  %v2279_v32 = vcombine.high %v2263_v44, %v2924_v0 }
 0xb80   :  { %v2305_v15 = vrot.slane %v3691_v51, %v3542_v28  ;;  %v1257_v37 = vsel %vm1236_vm11, %v3631_v59, %v1215_v3  ;;  %v1279_v33 = vrot.slane %v1271_v16, %v3734_v31  ;;  %v2215_v14 = vcombine.high %v2207_v6, %v2924_v0 }
 0xb81   :  { %2357 = vrot.lane.b32.xlu0 %v2180_v53, %s2934_s19  ;;  %2351 = vrot.lane.b32.xlu1 %v2294_v55, %s2931_s13  ;;  %v2296_v13 = vcombine.high %v3705_v61, %v2924_v0  ;;  %v2293_v36 = vrot.slane %v2279_v32, %v3547_v50  ;;  %v2245_v3 = vcombine.high %v3740_v9, %v2924_v0 }
 0xb82   :  { %v1217_v21 = vpop.permute.xlu1 %1216  ;;  %v1199_v5 = vpop.permute.xlu0 %1198  ;;  %v3765_v4 = vrot.slane %v2305_v15, %v3547_v50  ;;  %v2295_v44 = vcombine.high %v2278_v19, %v2924_v0  ;;  %v1295_v38 = vcombine.low %v1244_v48, %v1250_v39  ;;  %v1252_v53 = vsel %vm1236_vm11, %v3607_v25, %v3674_v43 }
 0xb83   :  { %v1253_v42 = vsel %vm1239_vm12, %v1251_v40, %v1199_v5  ;;  %v2214_v55 = vrot.slane %v2200_v52, %v3542_v28  ;;  %v1258_v5 = vsel %vm1236_vm11, %v3640_v49, %v1217_v21  ;;  %v2313_v25 = vcombine.high %v2305_v15, %v2924_v0 }
 0xb84   :  { %v2229_v26 = vrot.slane %v2215_v14, %v3547_v50  ;;  %v2199_v32 = vcombine.high %v3721_v7, %v2924_v0  ;;  %v2297_v41 = vcombine.high %v2293_v36, %v2924_v0 }
 0xb85   :  { %2373 = vrot.lane.b32.xlu0 %v2198_v23, %s2931_s13  ;;  %2359 = vrot.lane.b32.xlu1 %v2278_v19, %s2934_s19  ;;  %v2298_v19 = vcombine.high %v3691_v51, %v2924_v0  ;;  %v1303_v51 = vrot.slane %v1295_v38, %v3734_v31  ;;  %v2237_v2 = vrot.slane %v2214_v55, %v3547_v50 }
 0xb86   :  { %v1201_v54 = vpop.permute.xlu1 %1200  ;;  %v1223_v63 = vpop.permute.xlu0 %1222  ;;  %v2246_v48 = vcombine.high %v2229_v26, %v2924_v0 }
 0xb87   :  { %v1259_v45 = vsel %vm1239_vm12, %v1257_v37, %v1223_v63  ;;  %v1254_v11 = vsel %vm1239_vm12, %v1252_v53, %v1201_v54  ;;  %v2343_v54 = vcombine.high %v3765_v4, %v2924_v0  ;;  %v2312_v6 = vrot.slane %v2298_v19, %v3542_v28 }
 0xb88   :  { %v2230_v28 = vcombine.high %v2214_v55, %v2924_v0 }
 0xb89   :  { %2381 = vrot.lane.b32.xlu0 %v3721_v7, %s2934_s19  ;;  %2375 = vrot.lane.b32.xlu1 %v2296_v13, %s2931_s13  ;;  %v2327_v13 = vrot.slane %v2313_v25, %v3547_v50  ;;  %v3814_v22 = vrot.slane %v2312_v6, %v3547_v50  ;;  %v2247_v7 = vcombine.high %v2237_v2, %v2924_v0 }
 0xb8a   :  { %v1225_v12 = vpop.permute.xlu1 %1224  ;;  %v1207_v57 = vpop.permute.xlu0 %1206  ;;  %v2328_v20 = vcombine.high %v2312_v6, %v2924_v0 }
 0xb8b   :  { %v1255_v35 = vsel %vm1242_vm13, %v1253_v42, %v1207_v57  ;;  %v1260_v18 = vsel %vm1239_vm12, %v1258_v5, %v1225_v12  ;;  %v2244_v12 = vrot.slane %v2230_v28, %v3547_v50  ;;  %v2345_v57 = vcombine.high %v3814_v22, %v2924_v0 }
 0xb8c   :  { %v2342_v62 = vrot.slane %v2328_v20, %v3547_v50  ;;  %v2344_v15 = vcombine.high %v2327_v13, %v2924_v0 }
 0xb8d   :  { %2365 = vrot.lane.b32.xlu0 %v2197_v8, %s2932_s1  ;;  %2383 = vrot.lane.b32.xlu1 %v2293_v36, %s2934_s19  ;;  %v2248_v16 = vcombine.high %v2244_v12, %v2924_v0 }
 0xb8e   :  { %v1209_v24 = vpop.permute.xlu1 %1208  ;;  %v1231_v60 = vpop.permute.xlu0 %1230  ;;  %v2346_v8 = vcombine.high %v2342_v62, %v2924_v0 }
 0xb8f   :  { %v1261_v59 = vsel %vm1242_vm13, %v1259_v45, %v1231_v60  ;;  %v1256_v43 = vsel %vm1242_vm13, %v1254_v11, %v1209_v24 }
 0xb90   :  { %v1272_v46 = vcombine.low %v1255_v35, %v1261_v59 }
 0xb91   :  { %2397 = vrot.lane.b32.xlu0 %v2245_v3, %s2931_s13  ;;  %2367 = vrot.lane.b32.xlu1 %v2295_v44, %s2932_s1 }
 0xb92   :  { %v1286_v56 = vrot.slane %v1272_v46, %v3734_v31  ;;  %v1233_v23 = vpop.permute.xlu1 %1232 }
 0xb93   :  { %v1262_v49 = vsel %vm1242_vm13, %v1260_v18, %v1233_v23 }
 0xb94   :  { %v1287_v21 = vcombine.low %v1279_v33, %v1286_v56  ;;  %v1296_v58 = vcombine.low %v1256_v43, %v1262_v49 }
 0xb95   :  { %2405 = vrot.lane.b32.xlu0 %v2229_v26, %s2934_s19  ;;  %2399 = vrot.lane.b32.xlu1 %v2343_v54, %s2931_s13 }
 0xb96   :  { %v1294_v1 = vrot.slane %v1287_v21, %v3734_v31  ;;  %v1310_v27 = vrot.slane %v1296_v58, %v3734_v31 }
 0xb98   :  { %1325 = vst.msk [vmem:[%s3899_s11] ss:$2 sm:$0xf] %vm3790_vm14, %v1294_v1  ;;  %v1311_v29 = vcombine.low %v1303_v51, %v1310_v27 }
 0xb99   :  { %2389 = vrot.lane.b32.xlu0 %v2199_v32, %s2932_s1  ;;  %2407 = vrot.lane.b32.xlu1 %v2327_v13, %s2934_s19 }
 0xb9a   :  { %v1318_v17 = vrot.slane %v1311_v29, %v3734_v31 }
 0xb9c   :  { %2573 = vst.msk [vmem:[%s3899_s11 + $0x8] ss:$2 sm:$0xf] %vm3790_vm14, %v1318_v17 }
 0xb9d   :  { %2421 = vrot.lane.b32.xlu0 %v2247_v7, %s2931_s13  ;;  %2391 = vrot.lane.b32.xlu1 %v2297_v41, %s2932_s1 }
 0xba1   :  { %2429 = vrot.lane.b32.xlu0 %v2244_v12, %s2934_s19  ;;  %2423 = vrot.lane.b32.xlu1 %v2345_v57, %s2931_s13 }
 0xba5   :  { %2413 = vrot.lane.b32.xlu0 %v2246_v48, %s2932_s1  ;;  %2431 = vrot.lane.b32.xlu1 %v2342_v62, %s2934_s19 }
 0xba9   :  { %2437 = vrot.lane.b32.xlu0 %v2248_v16, %s2932_s1  ;;  %2415 = vrot.lane.b32.xlu1 %v2344_v15, %s2932_s1 }
 0xbad   :  { %2439 = vrot.lane.b32.xlu1 %v2346_v8, %s2932_s1 }
 0xbef   :  { %v2350_v36 = vpop.permute.xlu0 %2349 }
 0xbf0   :  { %v2443_v11 = vsel %vm1236_vm11, %v3679_v34, %v2350_v36 }
 0xbf3   :  { %v2352_v30 = vpop.permute.xlu1 %2351  ;;  %v2358_v40 = vpop.permute.xlu0 %2357 }
 0xbf4   :  { %v2445_v56 = vsel %vm1239_vm12, %v2443_v11, %v2358_v40  ;;  %v2444_v54 = vsel %vm1236_vm11, %v3688_v47, %v2352_v30 }
 0xbf7   :  { %v2360_v50 = vpop.permute.xlu1 %2359  ;;  %v2374_v52 = vpop.permute.xlu0 %2373 }
 0xbf8   :  { %v2449_v38 = vsel %vm1236_vm11, %v3694_v10, %v2374_v52  ;;  %v2446_v1 = vsel %vm1239_vm12, %v2444_v54, %v2360_v50 }
 0xbfb   :  { %v2376_v37 = vpop.permute.xlu1 %2375  ;;  %v2382_v39 = vpop.permute.xlu0 %2381 }
 0xbfc   :  { %v2451_v53 = vsel %vm1239_vm12, %v2449_v38, %v2382_v39  ;;  %v2450_v23 = vsel %vm1236_vm11, %v3705_v61, %v2376_v37 }
 0xbff   :  { %v2384_v42 = vpop.permute.xlu1 %2383  ;;  %v2366_v45 = vpop.permute.xlu0 %2365 }
 0xc00   :  { %v2447_v19 = vsel %vm1242_vm13, %v2445_v56, %v2366_v45  ;;  %v2452_v43 = vsel %vm1239_vm12, %v2450_v23, %v2384_v42 }
 0xc03   :  { %v2368_v24 = vpop.permute.xlu1 %2367  ;;  %v2398_v60 = vpop.permute.xlu0 %2397 }
 0xc04   :  { %v2455_v25 = vsel %vm1236_vm11, %v3740_v9, %v2398_v60  ;;  %v2448_v6 = vsel %vm1242_vm13, %v2446_v1, %v2368_v24 }
 0xc07   :  { %v2400_v33 = vpop.permute.xlu1 %2399  ;;  %v2406_v14 = vpop.permute.xlu0 %2405 }
 0xc08   :  { %v2457_v49 = vsel %vm1239_vm12, %v2455_v25, %v2406_v14  ;;  %v2456_v27 = vsel %vm1236_vm11, %v3765_v4, %v2400_v33 }
 0xc0b   :  { %v2408_v35 = vpop.permute.xlu1 %2407  ;;  %v2390_v59 = vpop.permute.xlu0 %2389 }
 0xc0c   :  { %v2453_v18 = vsel %vm1242_vm13, %v2451_v53, %v2390_v59  ;;  %v2458_v29 = vsel %vm1239_vm12, %v2456_v27, %v2408_v35 }
 0xc0d   :  { %v2475_v21 = vcombine.low %v2447_v19, %v2453_v18 }
 0xc0f   :  { %v2392_v46 = vpop.permute.xlu1 %2391  ;;  %v2422_v3 = vpop.permute.xlu0 %2421  ;;  %v2483_v47 = vrot.slane %v2475_v21, %v3734_v31 }
 0xc10   :  { %v2461_v10 = vsel %vm1236_vm11, %v2237_v2, %v2422_v3  ;;  %v2454_v61 = vsel %vm1242_vm13, %v2452_v43, %v2392_v46 }
 0xc11   :  { %v2499_v13 = vcombine.low %v2448_v6, %v2454_v61 }
 0xc13   :  { %v2424_v0 = vpop.permute.xlu1 %2423  ;;  %v2430_v44 = vpop.permute.xlu0 %2429  ;;  %v2507_v57 = vrot.slane %v2499_v13, %v3734_v31 }
 0xc14   :  { %v2463_v34 = vsel %vm1239_vm12, %v2461_v10, %v2430_v44  ;;  %v2462_v32 = vsel %vm1236_vm11, %v3814_v22, %v2424_v0 }
 0xc17   :  { %v2432_v55 = vpop.permute.xlu1 %2431  ;;  %v2414_v5 = vpop.permute.xlu0 %2413 }
 0xc18   :  { %v2459_v51 = vsel %vm1242_vm13, %v2457_v49, %v2414_v5  ;;  %v2464_v17 = vsel %vm1239_vm12, %v2462_v32, %v2432_v55 }
 0xc1b   :  { %v2416_v58 = vpop.permute.xlu1 %2415  ;;  %v2438_v26 = vpop.permute.xlu0 %2437 }
 0xc1c   :  { %v2465_v9 = vsel %vm1242_vm13, %v2463_v34, %v2438_v26  ;;  %v2460_v41 = vsel %vm1242_vm13, %v2458_v29, %v2416_v58 }
 0xc1d   :  { %v2476_v2 = vcombine.low %v2459_v51, %v2465_v9 }
 0xc1f   :  { %v2490_v28 = vrot.slane %v2476_v2, %v3734_v31  ;;  %v2440_v7 = vpop.permute.xlu1 %2439 }
 0xc20   :  { %v2466_v4 = vsel %vm1242_vm13, %v2464_v17, %v2440_v7 }
 0xc21   :  { %v2491_v20 = vcombine.low %v2483_v47, %v2490_v28  ;;  %v2500_v12 = vcombine.low %v2460_v41, %v2466_v4 }
 0xc23   :  { %v2498_v48 = vrot.slane %v2491_v20, %v3734_v31  ;;  %v2514_v22 = vrot.slane %v2500_v12, %v3734_v31 }
 0xc25   :  { %2620 = vst.msk [vmem:[%s3899_s11 + $0x1] ss:$2 sm:$0xf] %vm3790_vm14, %v2498_v48  ;;  %v2515_v62 = vcombine.low %v2507_v57, %v2514_v22 }
 0xc27   :  { %v2522_v16 = vrot.slane %v2515_v62, %v3734_v31 }
 0xc29   :  { %2621 = vst.msk [vmem:[%s3899_s11 + $0x9] ss:$2 sm:$0xf] %vm3790_vm14, %v2522_v16 }

</bundles_post_ra>
